<compile_context>
chip_gen: v7x
topology: tpu7x:2x2x1
jax: 0.10.0
libtpu: 0.0.40
codegen_flags: <defaults>
</compile_context>

<pallas_src>
import functools

import jax
import jax.numpy as jnp
from jax import lax
from jax.experimental import pallas as pl
from jax.experimental.pallas import tpu as pltpu


def _lstm_resid_kernel(xproj_ref, xres_ref, wh_ref, hlast_ref, h_scr, c_scr):
    """Grid = (batch_blocks, time_chunks); time (axis 1) is the recurrence."""
    chunk = pl.program_id(1)

    # New batch block => reset the carried state (h_0 = c_0 = 0).
    @pl.when(chunk == 0)
    def _():
        h_scr[...] = jnp.zeros_like(h_scr)
        c_scr[...] = jnp.zeros_like(c_scr)

    T = xproj_ref.shape[0]          # timesteps in this chunk (static)
    H = h_scr.shape[-1]
    wh = wh_ref[...]                # (H, 4H) VMEM-resident recurrent weights

    def step(t, carry):
        h_prev, c_prev = carry
        # x-side projections were precomputed outside the recurrence; the only
        # serial MXU work per step is one fused (B,H)x(H,4H) matmul.
        gates = xproj_ref[t] + jnp.dot(
            h_prev, wh, preferred_element_type=jnp.float32)          # (B, 4H)
        i_t = jax.nn.sigmoid(gates[:, 0 * H:1 * H])
        f_t = jax.nn.sigmoid(gates[:, 1 * H:2 * H])
        o_t = jax.nn.sigmoid(gates[:, 2 * H:3 * H])
        c_hat = jnp.tanh(gates[:, 3 * H:4 * H])
        c_t = f_t * c_prev + i_t * c_hat
        h_t = o_t * jnp.tanh(c_t) + xres_ref[t]                      # residual
        return (h_t, c_t)

    h, c = lax.fori_loop(0, T, step, (h_scr[...], c_scr[...]), unroll=True)
    h_scr[...] = h
    c_scr[...] = c

    # Last time chunk: emit the lane-dense last hidden state for this batch
    # block.  (fc + sigmoid are done in the wrapper; Dropout(0.7) is identity
    # in eval mode.)
    @pl.when(chunk == pl.num_programs(1) - 1)
    def _():
        hlast_ref[...] = h


@functools.partial(jax.jit, static_argnames=("time_chunk", "batch_block"))
def sentiment_forward(ids, emb_table, wx_cat, wh_cat, b_cat, w_res, b_res,
                      w_fc, b_fc, *, time_chunk=8, batch_block=None):
    """ids: (B, S) int32 token ids.  Returns (B,) probabilities."""
    B, S = ids.shape
    E = emb_table.shape[1]
    H = wh_cat.shape[0]

    # --- Plain-XLA glue (not the serial hot path) -------------------------
    # Embedding gather directly in time-major order (avoids a separate
    # (B,S,E)->(S,B,E) HBM transpose pass).  Row 0 of emb_table is zero
    # (padding_idx=0 semantics).
    x_tm = jnp.take(emb_table, ids.T, axis=0)                  # (S, B, E)
    # Hoisted, fully parallel x-side projections (one big MXU-friendly matmul
    # each): gate x-part and residual transform for ALL timesteps at once.
    xflat = x_tm.reshape(S * B, E)
    xproj = (xflat @ wx_cat + b_cat).reshape(S, B, 4 * H)      # (S, B, 4H)
    xres = (xflat @ w_res + b_res).reshape(S, B, H)            # (S, B, H)
    # TODO(synk): for large S on v6e/v7x, stream xproj/xres in bf16 (keep f32
    # h/c carries) to halve the per-step HBM->VMEM bytes.

    if batch_block is None:
        batch_block = B
    tb = int(batch_block)
    tc = int(time_chunk)
    assert S % tc == 0 and B % tb == 0, "pick time_chunk | S and batch_block | B"

    h_last = pl.pallas_call(
        _lstm_resid_kernel,
        out_shape=jax.ShapeDtypeStruct((B, H), jnp.float32),
        grid_spec=pltpu.PrefetchScalarGridSpec(
            num_scalar_prefetch=0,
            grid=(B // tb, S // tc),
            in_specs=[
                # Time-chunked slabs of the precomputed projections.
                pl.BlockSpec((tc, tb, 4 * H), lambda b, c: (c, b, 0)),
                pl.BlockSpec((tc, tb, H), lambda b, c: (c, b, 0)),
                # Recurrent weights: whole-array VMEM resident (single copy).
                pl.BlockSpec(memory_space=pltpu.MemorySpace.VMEM),
            ],
            out_specs=pl.BlockSpec((tb, H), lambda b, c: (b, 0)),
            scratch_shapes=[
                pltpu.VMEM((tb, H), jnp.float32),   # h carry (per batch block)
                pltpu.VMEM((tb, H), jnp.float32),   # c carry
            ],
        ),
        compiler_params=pltpu.CompilerParams(
            # Batch blocks are independent (megacore-parallel on v7x);
            # time chunks are a serial recurrence.
            dimension_semantics=("parallel", "arbitrary"),
            vmem_limit_bytes=32 * 1024 * 1024,
        ),
    )(xproj, xres, wh_cat)

    # Final FC + sigmoid on the last hidden state (Dropout is eval-identity).
    # Note: returns shape (B,) even for B == 1 (torch .squeeze() would give a
    # 0-d scalar there).
    logits = h_last @ w_fc + b_fc                               # (B,)
    return jax.nn.sigmoid(logits)


def _reference_forward(ids, emb_table, wx_cat, wh_cat, b_cat, w_res, b_res,
                       w_fc, b_fc):
    """Pure-JAX reference mirroring the PyTorch module (eval mode)."""
    x = jnp.take(emb_table, ids, axis=0)                        # (B, S, E)
    B, S, _ = x.shape
    H = wh_cat.shape[0]
    h = jnp.zeros((B, H), jnp.float32)
    c = jnp.zeros((B, H), jnp.float32)
    for t in range(S):
        x_t = x[:, t, :]
        gates = x_t @ wx_cat + h @ wh_cat + b_cat               # (B, 4H)
        i_t = jax.nn.sigmoid(gates[:, 0 * H:1 * H])
        f_t = jax.nn.sigmoid(gates[:, 1 * H:2 * H])
        o_t = jax.nn.sigmoid(gates[:, 2 * H:3 * H])
        c_hat = jnp.tanh(gates[:, 3 * H:4 * H])
        c = f_t * c + i_t * c_hat
        h = o_t * jnp.tanh(c) + (x_t @ w_res + b_res)
    return jax.nn.sigmoid(h @ w_fc + b_fc)


if __name__ == "__main__":
    # Small shapes consistent with the module (embed_dim != hidden_dim so the
    # residual transform is active, as in the default 128/256 config).
    # H=128 keeps the fused-gate slices lane-aligned.
    VOCAB, E, H, B, S = 50, 64, 128, 8, 16

    key = jax.random.PRNGKey(0)
    keys = jax.random.split(key, 9)

    emb_table = 0.1 * jax.random.normal(keys[0], (VOCAB, E), jnp.float32)
    emb_table = emb_table.at[0].set(0.0)                        # padding_idx=0

    # Gate weights stored concatenated along the output dim: [i | f | o | c_hat]
    wx_cat = 0.1 * jax.random.normal(keys[1], (E, 4 * H), jnp.float32)
    wh_cat = 0.1 * jax.random.normal(keys[2], (H, 4 * H), jnp.float32)
    b_cat = 0.1 * jax.random.normal(keys[3], (4 * H,), jnp.float32)
    w_res = 0.1 * jax.random.normal(keys[4], (E, H), jnp.float32)   # residual_transform
    b_res = 0.1 * jax.random.normal(keys[5], (H,), jnp.float32)
    w_fc = 0.1 * jax.random.normal(keys[6], (H,), jnp.float32)      # fc weight
    b_fc = 0.1 * jax.random.normal(keys[7], (), jnp.float32)        # fc bias

    ids = jax.random.randint(keys[8], (B, S), 0, VOCAB, jnp.int32)

    out = sentiment_forward(ids, emb_table, wx_cat, wh_cat, b_cat,
                            w_res, b_res, w_fc, b_fc,
                            time_chunk=8, batch_block=B)
    out = jax.block_until_ready(out)

    ref = _reference_forward(ids, emb_table, wx_cat, wh_cat, b_cat,
                             w_res, b_res, w_fc, b_fc)
    assert out.shape == (B,)
    assert jnp.allclose(out, ref, atol=1e-5, rtol=1e-5), (out, ref)

    print("KERNEL_OK")
</pallas_src>

<mosaic_0001>
module attributes {stable_mosaic.version = 11 : i64} {
  func.func @_lstm_resid_kernel(%arg0: i32, %arg1: i32, %arg2: memref<8x8x512xf32, #tpu.memory_space<vmem>>, %arg3: memref<8x8x128xf32, #tpu.memory_space<vmem>>, %arg4: memref<128x512xf32, #tpu.memory_space<vmem>>, %arg5: memref<8x128xf32, #tpu.memory_space<vmem>>, %arg6: memref<8x128xf32, #tpu.memory_space<vmem>>, %arg7: memref<8x128xf32, #tpu.memory_space<vmem>>) attributes {dimension_semantics = [#tpu.dimension_semantics<parallel>, #tpu.dimension_semantics<arbitrary>], iteration_bounds = array<i64: 1, 2>, scalar_prefetch = 0 : i64, scratch_operands = 2 : i64, tpu.core_type = #tpu.core_type<tc>, window_params = [{transform_indices = @transform_0, window_bounds = array<i64: 8, 8, 512>}, {transform_indices = @transform_1, window_bounds = array<i64: 8, 8, 128>}, {pipeline_mode = #tpu.pipeline_mode<synchronous>, transform_indices = @transform_2, window_bounds = array<i64: 128, 512>}, {transform_indices = @transform_3, window_bounds = array<i64: 8, 128>}]} {
    %c0_i32 = arith.constant 0 : i32
    %0 = arith.cmpi eq, %arg1, %c0_i32 : i32
    %1 = arith.extui %0 : i1 to i32
    %c0_i32_0 = arith.constant 0 : i32
    %2 = arith.cmpi ne, %1, %c0_i32_0 : i32
    scf.if %2 {
      %cst_76 = arith.constant 0.000000e+00 : f32
      %283 = vector.broadcast %cst_76 : f32 to vector<8x128xf32>
      %c0_77 = arith.constant 0 : index
      %c0_78 = arith.constant 0 : index
      %284 = vector.load %arg6[%c0_77, %c0_78] : memref<8x128xf32, #tpu.memory_space<vmem>>, vector<8x128xf32>
      tpu.vector_store %arg6[%c0_77, %c0_78], %283 {strides = array<i32>} : memref<8x128xf32, #tpu.memory_space<vmem>>, vector<8x128xf32>,
      %cst_79 = arith.constant 0.000000e+00 : f32
      %285 = vector.broadcast %cst_79 : f32 to vector<8x128xf32>
      %c0_80 = arith.constant 0 : index
      %c0_81 = arith.constant 0 : index
      %286 = vector.load %arg7[%c0_80, %c0_81] : memref<8x128xf32, #tpu.memory_space<vmem>>, vector<8x128xf32>
      tpu.vector_store %arg7[%c0_80, %c0_81], %285 {strides = array<i32>} : memref<8x128xf32, #tpu.memory_space<vmem>>, vector<8x128xf32>,
    } else {
    }
    %c0 = arith.constant 0 : index
    %c0_1 = arith.constant 0 : index
    %3 = vector.load %arg4[%c0, %c0_1] : memref<128x512xf32, #tpu.memory_space<vmem>>, vector<128x512xf32>
    %c0_2 = arith.constant 0 : index
    %c0_3 = arith.constant 0 : index
    %4 = vector.load %arg6[%c0_2, %c0_3] : memref<8x128xf32, #tpu.memory_space<vmem>>, vector<8x128xf32>
    %c0_4 = arith.constant 0 : index
    %c0_5 = arith.constant 0 : index
    %5 = vector.load %arg7[%c0_4, %c0_5] : memref<8x128xf32, #tpu.memory_space<vmem>>, vector<8x128xf32>
    %c0_i32_6 = arith.constant 0 : i32
    %6 = arith.index_cast %c0_i32_6 : i32 to index
    %c0_7 = arith.constant 0 : index
    %c0_8 = arith.constant 0 : index
    %7 = vector.load %arg2[%6, %c0_7, %c0_8] : memref<8x8x512xf32, #tpu.memory_space<vmem>>, vector<1x8x512xf32>
    %8 = vector.shape_cast %7 : vector<1x8x512xf32> to vector<8x512xf32>
    %cst = arith.constant dense<0.000000e+00> : vector<8x512xf32>
    %9 = tpu.matmul %4, %3, %cst {dimension_numbers = #tpu.dot_dimension_numbers<[1], [0], [0], [1], [0, 0, 1, 1], [], []>} : vector<8x128xf32>, vector<128x512xf32>, vector<8x512xf32> -> vector<8x512xf32>
    %10 = arith.addf %8, %9 : vector<8x512xf32>
    %11 = vector.extract_strided_slice %10 {offsets = [0, 0], sizes = [8, 128], strides = [1, 1]} : vector<8x512xf32> to vector<8x128xf32>
    %12 = arith.negf %11 : vector<8x128xf32>
    %13 = math.exp %12 : vector<8x128xf32>
    %cst_9 = arith.constant 1.000000e+00 : f32
    %14 = vector.broadcast %cst_9 : f32 to vector<8x128xf32>
    %15 = arith.addf %14, %13 : vector<8x128xf32>
    %16 = arith.divf %14, %15 : vector<8x128xf32>
    %17 = vector.extract_strided_slice %10 {offsets = [0, 128], sizes = [8, 128], strides = [1, 1]} : vector<8x512xf32> to vector<8x128xf32>
    %18 = arith.negf %17 : vector<8x128xf32>
    %19 = math.exp %18 : vector<8x128xf32>
    %cst_10 = arith.constant 1.000000e+00 : f32
    %20 = vector.broadcast %cst_10 : f32 to vector<8x128xf32>
    %21 = arith.addf %20, %19 : vector<8x128xf32>
    %22 = arith.divf %20, %21 : vector<8x128xf32>
    %23 = vector.extract_strided_slice %10 {offsets = [0, 256], sizes = [8, 128], strides = [1, 1]} : vector<8x512xf32> to vector<8x128xf32>
    %24 = arith.negf %23 : vector<8x128xf32>
    %25 = math.exp %24 : vector<8x128xf32>
    %cst_11 = arith.constant 1.000000e+00 : f32
    %26 = vector.broadcast %cst_11 : f32 to vector<8x128xf32>
    %27 = arith.addf %26, %25 : vector<8x128xf32>
    %28 = arith.divf %26, %27 : vector<8x128xf32>
    %29 = vector.extract_strided_slice %10 {offsets = [0, 384], sizes = [8, 128], strides = [1, 1]} : vector<8x512xf32> to vector<8x128xf32>
    %30 = math.tanh %29 : vector<8x128xf32>
    %31 = arith.mulf %22, %5 : vector<8x128xf32>
    %32 = arith.mulf %16, %30 : vector<8x128xf32>
    %33 = arith.addf %31, %32 : vector<8x128xf32>
    %34 = math.tanh %33 : vector<8x128xf32>
    %35 = arith.mulf %28, %34 : vector<8x128xf32>
    %36 = arith.index_cast %c0_i32_6 : i32 to index
    %c0_12 = arith.constant 0 : index
    %c0_13 = arith.constant 0 : index
    %37 = vector.load %arg3[%36, %c0_12, %c0_13] : memref<8x8x128xf32, #tpu.memory_space<vmem>>, vector<1x8x128xf32>
    %38 = vector.shape_cast %37 : vector<1x8x128xf32> to vector<8x128xf32>
    %39 = arith.addf %35, %38 : vector<8x128xf32>
    %c1_i32 = arith.constant 1 : i32
    %40 = arith.index_cast %c1_i32 : i32 to index
    %c0_14 = arith.constant 0 : index
    %c0_15 = arith.constant 0 : index
    %41 = vector.load %arg2[%40, %c0_14, %c0_15] : memref<8x8x512xf32, #tpu.memory_space<vmem>>, vector<1x8x512xf32>
    %42 = vector.shape_cast %41 : vector<1x8x512xf32> to vector<8x512xf32>
    %cst_16 = arith.constant dense<0.000000e+00> : vector<8x512xf32>
    %43 = tpu.matmul %39, %3, %cst_16 {dimension_numbers = #tpu.dot_dimension_numbers<[1], [0], [0], [1], [0, 0, 1, 1], [], []>} : vector<8x128xf32>, vector<128x512xf32>, vector<8x512xf32> -> vector<8x512xf32>
    %44 = arith.addf %42, %43 : vector<8x512xf32>
    %45 = vector.extract_strided_slice %44 {offsets = [0, 0], sizes = [8, 128], strides = [1, 1]} : vector<8x512xf32> to vector<8x128xf32>
    %46 = arith.negf %45 : vector<8x128xf32>
    %47 = math.exp %46 : vector<8x128xf32>
    %cst_17 = arith.constant 1.000000e+00 : f32
    %48 = vector.broadcast %cst_17 : f32 to vector<8x128xf32>
    %49 = arith.addf %48, %47 : vector<8x128xf32>
    %50 = arith.divf %48, %49 : vector<8x128xf32>
    %51 = vector.extract_strided_slice %44 {offsets = [0, 128], sizes = [8, 128], strides = [1, 1]} : vector<8x512xf32> to vector<8x128xf32>
    %52 = arith.negf %51 : vector<8x128xf32>
    %53 = math.exp %52 : vector<8x128xf32>
    %cst_18 = arith.constant 1.000000e+00 : f32
    %54 = vector.broadcast %cst_18 : f32 to vector<8x128xf32>
    %55 = arith.addf %54, %53 : vector<8x128xf32>
    %56 = arith.divf %54, %55 : vector<8x128xf32>
    %57 = vector.extract_strided_slice %44 {offsets = [0, 256], sizes = [8, 128], strides = [1, 1]} : vector<8x512xf32> to vector<8x128xf32>
    %58 = arith.negf %57 : vector<8x128xf32>
    %59 = math.exp %58 : vector<8x128xf32>
    %cst_19 = arith.constant 1.000000e+00 : f32
    %60 = vector.broadcast %cst_19 : f32 to vector<8x128xf32>
    %61 = arith.addf %60, %59 : vector<8x128xf32>
    %62 = arith.divf %60, %61 : vector<8x128xf32>
    %63 = vector.extract_strided_slice %44 {offsets = [0, 384], sizes = [8, 128], strides = [1, 1]} : vector<8x512xf32> to vector<8x128xf32>
    %64 = math.tanh %63 : vector<8x128xf32>
    %65 = arith.mulf %56, %33 : vector<8x128xf32>
    %66 = arith.mulf %50, %64 : vector<8x128xf32>
    %67 = arith.addf %65, %66 : vector<8x128xf32>
    %68 = math.tanh %67 : vector<8x128xf32>
    %69 = arith.mulf %62, %68 : vector<8x128xf32>
    %70 = arith.index_cast %c1_i32 : i32 to index
    %c0_20 = arith.constant 0 : index
    %c0_21 = arith.constant 0 : index
    %71 = vector.load %arg3[%70, %c0_20, %c0_21] : memref<8x8x128xf32, #tpu.memory_space<vmem>>, vector<1x8x128xf32>
    %72 = vector.shape_cast %71 : vector<1x8x128xf32> to vector<8x128xf32>
    %73 = arith.addf %69, %72 : vector<8x128xf32>
    %c2_i32 = arith.constant 2 : i32
    %74 = arith.index_cast %c2_i32 : i32 to index
    %c0_22 = arith.constant 0 : index
    %c0_23 = arith.constant 0 : index
    %75 = vector.load %arg2[%74, %c0_22, %c0_23] : memref<8x8x512xf32, #tpu.memory_space<vmem>>, vector<1x8x512xf32>
    %76 = vector.shape_cast %75 : vector<1x8x512xf32> to vector<8x512xf32>
    %cst_24 = arith.constant dense<0.000000e+00> : vector<8x512xf32>
    %77 = tpu.matmul %73, %3, %cst_24 {dimension_numbers = #tpu.dot_dimension_numbers<[1], [0], [0], [1], [0, 0, 1, 1], [], []>} : vector<8x128xf32>, vector<128x512xf32>, vector<8x512xf32> -> vector<8x512xf32>
    %78 = arith.addf %76, %77 : vector<8x512xf32>
    %79 = vector.extract_strided_slice %78 {offsets = [0, 0], sizes = [8, 128], strides = [1, 1]} : vector<8x512xf32> to vector<8x128xf32>
    %80 = arith.negf %79 : vector<8x128xf32>
    %81 = math.exp %80 : vector<8x128xf32>
    %cst_25 = arith.constant 1.000000e+00 : f32
    %82 = vector.broadcast %cst_25 : f32 to vector<8x128xf32>
    %83 = arith.addf %82, %81 : vector<8x128xf32>
    %84 = arith.divf %82, %83 : vector<8x128xf32>
    %85 = vector.extract_strided_slice %78 {offsets = [0, 128], sizes = [8, 128], strides = [1, 1]} : vector<8x512xf32> to vector<8x128xf32>
    %86 = arith.negf %85 : vector<8x128xf32>
    %87 = math.exp %86 : vector<8x128xf32>
    %cst_26 = arith.constant 1.000000e+00 : f32
    %88 = vector.broadcast %cst_26 : f32 to vector<8x128xf32>
    %89 = arith.addf %88, %87 : vector<8x128xf32>
    %90 = arith.divf %88, %89 : vector<8x128xf32>
    %91 = vector.extract_strided_slice %78 {offsets = [0, 256], sizes = [8, 128], strides = [1, 1]} : vector<8x512xf32> to vector<8x128xf32>
    %92 = arith.negf %91 : vector<8x128xf32>
    %93 = math.exp %92 : vector<8x128xf32>
    %cst_27 = arith.constant 1.000000e+00 : f32
    %94 = vector.broadcast %cst_27 : f32 to vector<8x128xf32>
    %95 = arith.addf %94, %93 : vector<8x128xf32>
    %96 = arith.divf %94, %95 : vector<8x128xf32>
    %97 = vector.extract_strided_slice %78 {offsets = [0, 384], sizes = [8, 128], strides = [1, 1]} : vector<8x512xf32> to vector<8x128xf32>
    %98 = math.tanh %97 : vector<8x128xf32>
    %99 = arith.mulf %90, %67 : vector<8x128xf32>
    %100 = arith.mulf %84, %98 : vector<8x128xf32>
    %101 = arith.addf %99, %100 : vector<8x128xf32>
    %102 = math.tanh %101 : vector<8x128xf32>
    %103 = arith.mulf %96, %102 : vector<8x128xf32>
    %104 = arith.index_cast %c2_i32 : i32 to index
    %c0_28 = arith.constant 0 : index
    %c0_29 = arith.constant 0 : index
    %105 = vector.load %arg3[%104, %c0_28, %c0_29] : memref<8x8x128xf32, #tpu.memory_space<vmem>>, vector<1x8x128xf32>
    %106 = vector.shape_cast %105 : vector<1x8x128xf32> to vector<8x128xf32>
    %107 = arith.addf %103, %106 : vector<8x128xf32>
    %c3_i32 = arith.constant 3 : i32
    %108 = arith.index_cast %c3_i32 : i32 to index
    %c0_30 = arith.constant 0 : index
    %c0_31 = arith.constant 0 : index
    %109 = vector.load %arg2[%108, %c0_30, %c0_31] : memref<8x8x512xf32, #tpu.memory_space<vmem>>, vector<1x8x512xf32>
    %110 = vector.shape_cast %109 : vector<1x8x512xf32> to vector<8x512xf32>
    %cst_32 = arith.constant dense<0.000000e+00> : vector<8x512xf32>
    %111 = tpu.matmul %107, %3, %cst_32 {dimension_numbers = #tpu.dot_dimension_numbers<[1], [0], [0], [1], [0, 0, 1, 1], [], []>} : vector<8x128xf32>, vector<128x512xf32>, vector<8x512xf32> -> vector<8x512xf32>
    %112 = arith.addf %110, %111 : vector<8x512xf32>
    %113 = vector.extract_strided_slice %112 {offsets = [0, 0], sizes = [8, 128], strides = [1, 1]} : vector<8x512xf32> to vector<8x128xf32>
    %114 = arith.negf %113 : vector<8x128xf32>
    %115 = math.exp %114 : vector<8x128xf32>
    %cst_33 = arith.constant 1.000000e+00 : f32
    %116 = vector.broadcast %cst_33 : f32 to vector<8x128xf32>
    %117 = arith.addf %116, %115 : vector<8x128xf32>
    %118 = arith.divf %116, %117 : vector<8x128xf32>
    %119 = vector.extract_strided_slice %112 {offsets = [0, 128], sizes = [8, 128], strides = [1, 1]} : vector<8x512xf32> to vector<8x128xf32>
    %120 = arith.negf %119 : vector<8x128xf32>
    %121 = math.exp %120 : vector<8x128xf32>
    %cst_34 = arith.constant 1.000000e+00 : f32
    %122 = vector.broadcast %cst_34 : f32 to vector<8x128xf32>
    %123 = arith.addf %122, %121 : vector<8x128xf32>
    %124 = arith.divf %122, %123 : vector<8x128xf32>
    %125 = vector.extract_strided_slice %112 {offsets = [0, 256], sizes = [8, 128], strides = [1, 1]} : vector<8x512xf32> to vector<8x128xf32>
    %126 = arith.negf %125 : vector<8x128xf32>
    %127 = math.exp %126 : vector<8x128xf32>
    %cst_35 = arith.constant 1.000000e+00 : f32
    %128 = vector.broadcast %cst_35 : f32 to vector<8x128xf32>
    %129 = arith.addf %128, %127 : vector<8x128xf32>
    %130 = arith.divf %128, %129 : vector<8x128xf32>
    %131 = vector.extract_strided_slice %112 {offsets = [0, 384], sizes = [8, 128], strides = [1, 1]} : vector<8x512xf32> to vector<8x128xf32>
    %132 = math.tanh %131 : vector<8x128xf32>
    %133 = arith.mulf %124, %101 : vector<8x128xf32>
    %134 = arith.mulf %118, %132 : vector<8x128xf32>
    %135 = arith.addf %133, %134 : vector<8x128xf32>
    %136 = math.tanh %135 : vector<8x128xf32>
    %137 = arith.mulf %130, %136 : vector<8x128xf32>
    %138 = arith.index_cast %c3_i32 : i32 to index
    %c0_36 = arith.constant 0 : index
    %c0_37 = arith.constant 0 : index
    %139 = vector.load %arg3[%138, %c0_36, %c0_37] : memref<8x8x128xf32, #tpu.memory_space<vmem>>, vector<1x8x128xf32>
    %140 = vector.shape_cast %139 : vector<1x8x128xf32> to vector<8x128xf32>
    %141 = arith.addf %137, %140 : vector<8x128xf32>
    %c4_i32 = arith.constant 4 : i32
    %142 = arith.index_cast %c4_i32 : i32 to index
    %c0_38 = arith.constant 0 : index
    %c0_39 = arith.constant 0 : index
    %143 = vector.load %arg2[%142, %c0_38, %c0_39] : memref<8x8x512xf32, #tpu.memory_space<vmem>>, vector<1x8x512xf32>
    %144 = vector.shape_cast %143 : vector<1x8x512xf32> to vector<8x512xf32>
    %cst_40 = arith.constant dense<0.000000e+00> : vector<8x512xf32>
    %145 = tpu.matmul %141, %3, %cst_40 {dimension_numbers = #tpu.dot_dimension_numbers<[1], [0], [0], [1], [0, 0, 1, 1], [], []>} : vector<8x128xf32>, vector<128x512xf32>, vector<8x512xf32> -> vector<8x512xf32>
    %146 = arith.addf %144, %145 : vector<8x512xf32>
    %147 = vector.extract_strided_slice %146 {offsets = [0, 0], sizes = [8, 128], strides = [1, 1]} : vector<8x512xf32> to vector<8x128xf32>
    %148 = arith.negf %147 : vector<8x128xf32>
    %149 = math.exp %148 : vector<8x128xf32>
    %cst_41 = arith.constant 1.000000e+00 : f32
    %150 = vector.broadcast %cst_41 : f32 to vector<8x128xf32>
    %151 = arith.addf %150, %149 : vector<8x128xf32>
    %152 = arith.divf %150, %151 : vector<8x128xf32>
    %153 = vector.extract_strided_slice %146 {offsets = [0, 128], sizes = [8, 128], strides = [1, 1]} : vector<8x512xf32> to vector<8x128xf32>
    %154 = arith.negf %153 : vector<8x128xf32>
    %155 = math.exp %154 : vector<8x128xf32>
    %cst_42 = arith.constant 1.000000e+00 : f32
    %156 = vector.broadcast %cst_42 : f32 to vector<8x128xf32>
    %157 = arith.addf %156, %155 : vector<8x128xf32>
    %158 = arith.divf %156, %157 : vector<8x128xf32>
    %159 = vector.extract_strided_slice %146 {offsets = [0, 256], sizes = [8, 128], strides = [1, 1]} : vector<8x512xf32> to vector<8x128xf32>
    %160 = arith.negf %159 : vector<8x128xf32>
    %161 = math.exp %160 : vector<8x128xf32>
    %cst_43 = arith.constant 1.000000e+00 : f32
    %162 = vector.broadcast %cst_43 : f32 to vector<8x128xf32>
    %163 = arith.addf %162, %161 : vector<8x128xf32>
    %164 = arith.divf %162, %163 : vector<8x128xf32>
    %165 = vector.extract_strided_slice %146 {offsets = [0, 384], sizes = [8, 128], strides = [1, 1]} : vector<8x512xf32> to vector<8x128xf32>
    %166 = math.tanh %165 : vector<8x128xf32>
    %167 = arith.mulf %158, %135 : vector<8x128xf32>
    %168 = arith.mulf %152, %166 : vector<8x128xf32>
    %169 = arith.addf %167, %168 : vector<8x128xf32>
    %170 = math.tanh %169 : vector<8x128xf32>
    %171 = arith.mulf %164, %170 : vector<8x128xf32>
    %172 = arith.index_cast %c4_i32 : i32 to index
    %c0_44 = arith.constant 0 : index
    %c0_45 = arith.constant 0 : index
    %173 = vector.load %arg3[%172, %c0_44, %c0_45] : memref<8x8x128xf32, #tpu.memory_space<vmem>>, vector<1x8x128xf32>
    %174 = vector.shape_cast %173 : vector<1x8x128xf32> to vector<8x128xf32>
    %175 = arith.addf %171, %174 : vector<8x128xf32>
    %c5_i32 = arith.constant 5 : i32
    %176 = arith.index_cast %c5_i32 : i32 to index
    %c0_46 = arith.constant 0 : index
    %c0_47 = arith.constant 0 : index
    %177 = vector.load %arg2[%176, %c0_46, %c0_47] : memref<8x8x512xf32, #tpu.memory_space<vmem>>, vector<1x8x512xf32>
    %178 = vector.shape_cast %177 : vector<1x8x512xf32> to vector<8x512xf32>
    %cst_48 = arith.constant dense<0.000000e+00> : vector<8x512xf32>
    %179 = tpu.matmul %175, %3, %cst_48 {dimension_numbers = #tpu.dot_dimension_numbers<[1], [0], [0], [1], [0, 0, 1, 1], [], []>} : vector<8x128xf32>, vector<128x512xf32>, vector<8x512xf32> -> vector<8x512xf32>
    %180 = arith.addf %178, %179 : vector<8x512xf32>
    %181 = vector.extract_strided_slice %180 {offsets = [0, 0], sizes = [8, 128], strides = [1, 1]} : vector<8x512xf32> to vector<8x128xf32>
    %182 = arith.negf %181 : vector<8x128xf32>
    %183 = math.exp %182 : vector<8x128xf32>
    %cst_49 = arith.constant 1.000000e+00 : f32
    %184 = vector.broadcast %cst_49 : f32 to vector<8x128xf32>
    %185 = arith.addf %184, %183 : vector<8x128xf32>
    %186 = arith.divf %184, %185 : vector<8x128xf32>
    %187 = vector.extract_strided_slice %180 {offsets = [0, 128], sizes = [8, 128], strides = [1, 1]} : vector<8x512xf32> to vector<8x128xf32>
    %188 = arith.negf %187 : vector<8x128xf32>
    %189 = math.exp %188 : vector<8x128xf32>
    %cst_50 = arith.constant 1.000000e+00 : f32
    %190 = vector.broadcast %cst_50 : f32 to vector<8x128xf32>
    %191 = arith.addf %190, %189 : vector<8x128xf32>
    %192 = arith.divf %190, %191 : vector<8x128xf32>
    %193 = vector.extract_strided_slice %180 {offsets = [0, 256], sizes = [8, 128], strides = [1, 1]} : vector<8x512xf32> to vector<8x128xf32>
    %194 = arith.negf %193 : vector<8x128xf32>
    %195 = math.exp %194 : vector<8x128xf32>
    %cst_51 = arith.constant 1.000000e+00 : f32
    %196 = vector.broadcast %cst_51 : f32 to vector<8x128xf32>
    %197 = arith.addf %196, %195 : vector<8x128xf32>
    %198 = arith.divf %196, %197 : vector<8x128xf32>
    %199 = vector.extract_strided_slice %180 {offsets = [0, 384], sizes = [8, 128], strides = [1, 1]} : vector<8x512xf32> to vector<8x128xf32>
    %200 = math.tanh %199 : vector<8x128xf32>
    %201 = arith.mulf %192, %169 : vector<8x128xf32>
    %202 = arith.mulf %186, %200 : vector<8x128xf32>
    %203 = arith.addf %201, %202 : vector<8x128xf32>
    %204 = math.tanh %203 : vector<8x128xf32>
    %205 = arith.mulf %198, %204 : vector<8x128xf32>
    %206 = arith.index_cast %c5_i32 : i32 to index
    %c0_52 = arith.constant 0 : index
    %c0_53 = arith.constant 0 : index
    %207 = vector.load %arg3[%206, %c0_52, %c0_53] : memref<8x8x128xf32, #tpu.memory_space<vmem>>, vector<1x8x128xf32>
    %208 = vector.shape_cast %207 : vector<1x8x128xf32> to vector<8x128xf32>
    %209 = arith.addf %205, %208 : vector<8x128xf32>
    %c6_i32 = arith.constant 6 : i32
    %210 = arith.index_cast %c6_i32 : i32 to index
    %c0_54 = arith.constant 0 : index
    %c0_55 = arith.constant 0 : index
    %211 = vector.load %arg2[%210, %c0_54, %c0_55] : memref<8x8x512xf32, #tpu.memory_space<vmem>>, vector<1x8x512xf32>
    %212 = vector.shape_cast %211 : vector<1x8x512xf32> to vector<8x512xf32>
    %cst_56 = arith.constant dense<0.000000e+00> : vector<8x512xf32>
    %213 = tpu.matmul %209, %3, %cst_56 {dimension_numbers = #tpu.dot_dimension_numbers<[1], [0], [0], [1], [0, 0, 1, 1], [], []>} : vector<8x128xf32>, vector<128x512xf32>, vector<8x512xf32> -> vector<8x512xf32>
    %214 = arith.addf %212, %213 : vector<8x512xf32>
    %215 = vector.extract_strided_slice %214 {offsets = [0, 0], sizes = [8, 128], strides = [1, 1]} : vector<8x512xf32> to vector<8x128xf32>
    %216 = arith.negf %215 : vector<8x128xf32>
    %217 = math.exp %216 : vector<8x128xf32>
    %cst_57 = arith.constant 1.000000e+00 : f32
    %218 = vector.broadcast %cst_57 : f32 to vector<8x128xf32>
    %219 = arith.addf %218, %217 : vector<8x128xf32>
    %220 = arith.divf %218, %219 : vector<8x128xf32>
    %221 = vector.extract_strided_slice %214 {offsets = [0, 128], sizes = [8, 128], strides = [1, 1]} : vector<8x512xf32> to vector<8x128xf32>
    %222 = arith.negf %221 : vector<8x128xf32>
    %223 = math.exp %222 : vector<8x128xf32>
    %cst_58 = arith.constant 1.000000e+00 : f32
    %224 = vector.broadcast %cst_58 : f32 to vector<8x128xf32>
    %225 = arith.addf %224, %223 : vector<8x128xf32>
    %226 = arith.divf %224, %225 : vector<8x128xf32>
    %227 = vector.extract_strided_slice %214 {offsets = [0, 256], sizes = [8, 128], strides = [1, 1]} : vector<8x512xf32> to vector<8x128xf32>
    %228 = arith.negf %227 : vector<8x128xf32>
    %229 = math.exp %228 : vector<8x128xf32>
    %cst_59 = arith.constant 1.000000e+00 : f32
    %230 = vector.broadcast %cst_59 : f32 to vector<8x128xf32>
    %231 = arith.addf %230, %229 : vector<8x128xf32>
    %232 = arith.divf %230, %231 : vector<8x128xf32>
    %233 = vector.extract_strided_slice %214 {offsets = [0, 384], sizes = [8, 128], strides = [1, 1]} : vector<8x512xf32> to vector<8x128xf32>
    %234 = math.tanh %233 : vector<8x128xf32>
    %235 = arith.mulf %226, %203 : vector<8x128xf32>
    %236 = arith.mulf %220, %234 : vector<8x128xf32>
    %237 = arith.addf %235, %236 : vector<8x128xf32>
    %238 = math.tanh %237 : vector<8x128xf32>
    %239 = arith.mulf %232, %238 : vector<8x128xf32>
    %240 = arith.index_cast %c6_i32 : i32 to index
    %c0_60 = arith.constant 0 : index
    %c0_61 = arith.constant 0 : index
    %241 = vector.load %arg3[%240, %c0_60, %c0_61] : memref<8x8x128xf32, #tpu.memory_space<vmem>>, vector<1x8x128xf32>
    %242 = vector.shape_cast %241 : vector<1x8x128xf32> to vector<8x128xf32>
    %243 = arith.addf %239, %242 : vector<8x128xf32>
    %c7_i32 = arith.constant 7 : i32
    %244 = arith.index_cast %c7_i32 : i32 to index
    %c0_62 = arith.constant 0 : index
    %c0_63 = arith.constant 0 : index
    %245 = vector.load %arg2[%244, %c0_62, %c0_63] : memref<8x8x512xf32, #tpu.memory_space<vmem>>, vector<1x8x512xf32>
    %246 = vector.shape_cast %245 : vector<1x8x512xf32> to vector<8x512xf32>
    %cst_64 = arith.constant dense<0.000000e+00> : vector<8x512xf32>
    %247 = tpu.matmul %243, %3, %cst_64 {dimension_numbers = #tpu.dot_dimension_numbers<[1], [0], [0], [1], [0, 0, 1, 1], [], []>} : vector<8x128xf32>, vector<128x512xf32>, vector<8x512xf32> -> vector<8x512xf32>
    %248 = arith.addf %246, %247 : vector<8x512xf32>
    %249 = vector.extract_strided_slice %248 {offsets = [0, 0], sizes = [8, 128], strides = [1, 1]} : vector<8x512xf32> to vector<8x128xf32>
    %250 = arith.negf %249 : vector<8x128xf32>
    %251 = math.exp %250 : vector<8x128xf32>
    %cst_65 = arith.constant 1.000000e+00 : f32
    %252 = vector.broadcast %cst_65 : f32 to vector<8x128xf32>
    %253 = arith.addf %252, %251 : vector<8x128xf32>
    %254 = arith.divf %252, %253 : vector<8x128xf32>
    %255 = vector.extract_strided_slice %248 {offsets = [0, 128], sizes = [8, 128], strides = [1, 1]} : vector<8x512xf32> to vector<8x128xf32>
    %256 = arith.negf %255 : vector<8x128xf32>
    %257 = math.exp %256 : vector<8x128xf32>
    %cst_66 = arith.constant 1.000000e+00 : f32
    %258 = vector.broadcast %cst_66 : f32 to vector<8x128xf32>
    %259 = arith.addf %258, %257 : vector<8x128xf32>
    %260 = arith.divf %258, %259 : vector<8x128xf32>
    %261 = vector.extract_strided_slice %248 {offsets = [0, 256], sizes = [8, 128], strides = [1, 1]} : vector<8x512xf32> to vector<8x128xf32>
    %262 = arith.negf %261 : vector<8x128xf32>
    %263 = math.exp %262 : vector<8x128xf32>
    %cst_67 = arith.constant 1.000000e+00 : f32
    %264 = vector.broadcast %cst_67 : f32 to vector<8x128xf32>
    %265 = arith.addf %264, %263 : vector<8x128xf32>
    %266 = arith.divf %264, %265 : vector<8x128xf32>
    %267 = vector.extract_strided_slice %248 {offsets = [0, 384], sizes = [8, 128], strides = [1, 1]} : vector<8x512xf32> to vector<8x128xf32>
    %268 = math.tanh %267 : vector<8x128xf32>
    %269 = arith.mulf %260, %237 : vector<8x128xf32>
    %270 = arith.mulf %254, %268 : vector<8x128xf32>
    %271 = arith.addf %269, %270 : vector<8x128xf32>
    %272 = math.tanh %271 : vector<8x128xf32>
    %273 = arith.mulf %266, %272 : vector<8x128xf32>
    %274 = arith.index_cast %c7_i32 : i32 to index
    %c0_68 = arith.constant 0 : index
    %c0_69 = arith.constant 0 : index
    %275 = vector.load %arg3[%274, %c0_68, %c0_69] : memref<8x8x128xf32, #tpu.memory_space<vmem>>, vector<1x8x128xf32>
    %276 = vector.shape_cast %275 : vector<1x8x128xf32> to vector<8x128xf32>
    %277 = arith.addf %273, %276 : vector<8x128xf32>
    %c8_i32 = arith.constant 8 : i32
    %c0_70 = arith.constant 0 : index
    %c0_71 = arith.constant 0 : index
    %278 = vector.load %arg6[%c0_70, %c0_71] : memref<8x128xf32, #tpu.memory_space<vmem>>, vector<8x128xf32>
    tpu.vector_store %arg6[%c0_70, %c0_71], %277 {strides = array<i32>} : memref<8x128xf32, #tpu.memory_space<vmem>>, vector<8x128xf32>,
    %c0_72 = arith.constant 0 : index
    %c0_73 = arith.constant 0 : index
    %279 = vector.load %arg7[%c0_72, %c0_73] : memref<8x128xf32, #tpu.memory_space<vmem>>, vector<8x128xf32>
    tpu.vector_store %arg7[%c0_72, %c0_73], %271 {strides = array<i32>} : memref<8x128xf32, #tpu.memory_space<vmem>>, vector<8x128xf32>,
    %c1_i32_74 = arith.constant 1 : i32
    %280 = arith.cmpi eq, %arg1, %c1_i32_74 : i32
    %281 = arith.extui %280 : i1 to i32
    %c0_i32_75 = arith.constant 0 : i32
    %282 = arith.cmpi ne, %281, %c0_i32_75 : i32
    scf.if %282 {
      %c0_76 = arith.constant 0 : index
      %c0_77 = arith.constant 0 : index
      %283 = vector.load %arg5[%c0_76, %c0_77] : memref<8x128xf32, #tpu.memory_space<vmem>>, vector<8x128xf32>
      tpu.vector_store %arg5[%c0_76, %c0_77], %277 {strides = array<i32>} : memref<8x128xf32, #tpu.memory_space<vmem>>, vector<8x128xf32>,
    } else {
    }
    return
  }
  func.func @transform_0(%arg0: i32, %arg1: i32) -> (i32, i32, i32) {
    %c0_i32 = arith.constant 0 : i32
    %c0_i32_0 = arith.constant 0 : i32
    return %arg1, %arg0, %c0_i32 : i32, i32, i32
  }
  func.func @transform_1(%arg0: i32, %arg1: i32) -> (i32, i32, i32) {
    %c0_i32 = arith.constant 0 : i32
    %c0_i32_0 = arith.constant 0 : i32
    return %arg1, %arg0, %c0_i32 : i32, i32, i32
  }
  func.func @transform_2(%arg0: i32, %arg1: i32) -> (i32, i32) {
    %c0_i32 = arith.constant 0 : i32
    %c0_i32_0 = arith.constant 0 : i32
    %c0_i32_1 = arith.constant 0 : i32
    return %c0_i32, %c0_i32_0 : i32, i32
  }
  func.func @transform_3(%arg0: i32, %arg1: i32) -> (i32, i32) {
    %c0_i32 = arith.constant 0 : i32
    %c0_i32_0 = arith.constant 0 : i32
    return %arg0, %c0_i32 : i32, i32
  }
}

</mosaic_0001>

<bundles_post_ra>
// kernel: sentiment_forward.1
= control target key start
LH: loop header
LB: loop body
LE: loop exit
PB: predicated region body
PF: predicated region fallthrough
CT: control target
= control target key end

     0   :  { %s2603_s12 = smov 0   ;;  %s2605_s13 = smov 0   ;;  %s3240_s0 = inlined_call_operand.vmem [shape: f32[16,8,512], index: 0, kind: input, shape index: {}]   ;;  %s3241_s1 = inlined_call_operand.vmem [shape: f32[16,8,128], index: 1, kind: input, shape index: {}]   ;;  %s3242_s2 = inlined_call_operand.vmem [shape: f32[128,512], index: 2, kind: input, shape index: {}]   ;;  %s3243_s3 = inlined_call_operand.vmem [shape: f32[8,128], index: 3, kind: output, shape index: {}]  }
   0x1   :  { %s2607_s14 = smov 0  }
   0x2 LB: > { %s22_s15 = sadd.s32 1, %s2575_s13  ;;  %p1820_p0 = scmp.ge.s32.totalorder %s2579_s14, 1  ;;  %s2579_s14 = sphi %s2607_s14, %s13_s14   ;;  %s2575_s13 = sphi %s2605_s13, %s3245_s13   ;;  %s2571_s12 = sphi %s2603_s12, %s3244_s12  }
   0x3   : > { %p23_p1 = scmp.ge.s32.totalorder %s22_s15, 2  ;;  %p173_p2 = scmp.lt.s32.totalorder %s2579_s14, 3 }
   0x5   : > { %s3247_s15 = smov (%p23_p1, %s22_s15), 0  ;;  %p174_p3 = pnand %p1820_p0, %p173_p2 }
   0x6   : > { %s1821_s16 = sshll.u32 (!%p174_p3), %s2571_s12, 3  ;;  %p1826_p5 = scmp.ne.s32.totalorder (!%p174_p3), %s2571_s12, 0 }
   0x7   : > { %177 = sbr.rel (%p174_p3) target bundleno = 2138 (0x85a), region = 32  ;;  %p210_p4 = scmp.lt.s32.totalorder (!%p174_p3), %s1821_s16, 15 }
   0xe   : > { %s3249_s16 = smov (!%p210_p4, %s1821_s16), 15  ;;  %236 = sbr.rel (%p1826_p5) target bundleno = 21 (0x15), region = 36 }
   0xf   : > { %s1890_s17 = sshll.u32 %s3249_s16, 5  ;;  %s1825_s18 = sshll.u32 %s3249_s16, 3  ;;  %v2581_v0 = vmov (!%p1826_p5), 0.0  }
  0x10   : > { %s2627_s21 = scalar_lea.vmem %s3240_s0, %s1890_s17  ;;  %s2632_s24 = scalar_lea.vmem %s3241_s1, %s1825_s18  ;;  %237 = vst [vmem:[#allocation2] sm:$0xff] (!%p1826_p5), %v2581_v0  ;;  %238 = vst [vmem:[#allocation3] sm:$0xff] (!%p1826_p5), %v2581_v0 }
  0x15 PF: > { %v240_v1 = vld [vmem:[%s3242_s2 + $0x8] sm:$0xff]  ;;  %v239_v3 = vld [vmem:[%s3242_s2] sm:$0xff]  ;;  %v2582_v8 = vmov 0.0   ;;  %v242_v20 = vld [vmem:[%s3242_s2 + $0x18] sm:$0xff]  ;;  %p1886_p6 = scmp.ne.s32.totalorder %s2571_s12, 1 }
  0x16   : > { %v244_v2 = vld [vmem:[%s3242_s2 + $0x28] sm:$0xff]  ;;  %v243_v5 = vld [vmem:[%s3242_s2 + $0x20] sm:$0xff]  ;;  %373 = vmatprep.mubr.f32.mxu0 %v2582_v8  ;;  %444 = vmatprep.mubr.f32.mxu1 %v2582_v8  ;;  %v246_v21 = vld [vmem:[%s3242_s2 + $0x38] sm:$0xff] }
  0x17   : > { %v2644_v4 = vpack.c.bf16 %v244_v2, %v240_v1  ;;  %v248_v6 = vld [vmem:[%s3242_s2 + $0x48] sm:$0xff]  ;;  %v2657_v9 = vpack.c.bf16 %v243_v5, %v239_v3  ;;  %v247_v11 = vld [vmem:[%s3242_s2 + $0x40] sm:$0xff]  ;;  %v2698_v23 = vpack.c.bf16 %v246_v21, %v242_v20  ;;  %v241_v24 = vld [vmem:[%s3242_s2 + $0x10] sm:$0xff] }
  0x18   : > { %v252_v7 = vld [vmem:[%s3242_s2 + $0x68] sm:$0xff]  ;;  %v251_v12 = vld [vmem:[%s3242_s2 + $0x60] sm:$0xff]  ;;  %v245_v25 = vld [vmem:[%s3242_s2 + $0x30] sm:$0xff] }
  0x19   : > { %v2659_v10 = vpack.c.bf16 %v252_v7, %v248_v6  ;;  %v256_v13 = vld [vmem:[%s3242_s2 + $0x88] sm:$0xff]  ;;  %1892 = vmatprep.subr.bf16.mxu0 %v2644_v4  ;;  %v2675_v15 = vpack.c.bf16 %v251_v12, %v247_v11  ;;  %v255_v16 = vld [vmem:[%s3242_s2 + $0x80] sm:$0xff]  ;;  %v2706_v26 = vpack.c.bf16 %v245_v25, %v241_v24  ;;  %1924 = vmatprep.subr.bf16.mxu1 %v2698_v23  ;;  %v250_v28 = vld [vmem:[%s3242_s2 + $0x58] sm:$0xff] }
  0x1a   : > { %v260_v14 = vld [vmem:[%s3242_s2 + $0xa8] sm:$0xff]  ;;  %1894 = vmatpush1.bf16.msra.mxu0 %v2657_v9  ;;  %v259_v17 = vld [vmem:[%s3242_s2 + $0xa0] sm:$0xff]  ;;  %v254_v29 = vld [vmem:[%s3242_s2 + $0x78] sm:$0xff] }
  0x1b   : > { %1896 = vmatprep.subr.bf16.mxu0 %v2659_v10  ;;  %v2684_v18 = vpack.c.bf16 %v260_v14, %v256_v13  ;;  %v264_v19 = vld [vmem:[%s3242_s2 + $0xc8] sm:$0xff]  ;;  %v2709_v27 = vpack.c.bf16 %v259_v17, %v255_v16  ;;  %v249_v30 = vld [vmem:[%s3242_s2 + $0x50] sm:$0xff]  ;;  %v263_v32 = vld [vmem:[%s3242_s2 + $0xc0] sm:$0xff]  ;;  %1926 = vmatpush1.bf16.msra.mxu1 %v2706_v26  ;;  %v2731_v34 = vpack.c.bf16 %v254_v29, %v250_v28 }
  0x1c   : > { %v268_v22 = vld [vmem:[%s3242_s2 + $0xe8] sm:$0xff]  ;;  %v267_v33 = vld [vmem:[%s3242_s2 + $0xe0] sm:$0xff]  ;;  %v253_v35 = vld [vmem:[%s3242_s2 + $0x70] sm:$0xff] }
  0x1d   : > { %v2722_v31 = vpack.c.bf16 %v268_v22, %v264_v19  ;;  %v272_v36 = vld [vmem:[%s3242_s2 + $0x108] sm:$0xff]  ;;  %v2742_v38 = vpack.c.bf16 %v253_v35, %v249_v30  ;;  %v258_v39 = vld [vmem:[%s3242_s2 + $0x98] sm:$0xff]  ;;  %1928 = vmatprep.subr.bf16.mxu1 %v2731_v34  ;;  %v257_v41 = vld [vmem:[%s3242_s2 + $0x90] sm:$0xff]  ;;  %v2758_v43 = vpack.c.bf16 %v267_v33, %v263_v32 }
  0x1e   : > { %1898 = vmatpush1.bf16.msra.mxu0 %v2675_v15  ;;  %v276_v37 = vld [vmem:[%s3242_s2 + $0x128] sm:$0xff]  ;;  %v262_v40 = vld [vmem:[%s3242_s2 + $0xb8] sm:$0xff]  ;;  %v261_v42 = vld [vmem:[%s3242_s2 + $0xb0] sm:$0xff] }
  0x1f   : > { %1900 = vmatprep.subr.bf16.mxu0 %v2684_v18  ;;  %v271_v44 = vld [vmem:[%s3242_s2 + $0x100] sm:$0xff]  ;;  %v2766_v46 = vpack.c.bf16 %v262_v40, %v258_v39  ;;  %v2769_v47 = vpack.c.bf16 %v276_v37, %v272_v36  ;;  %1930 = vmatpush1.bf16.msra.mxu1 %v2742_v38  ;;  %v280_v48 = vld [vmem:[%s3242_s2 + $0x148] sm:$0xff]  ;;  %v2775_v49 = vpack.c.bf16 %v261_v42, %v257_v41  ;;  %v266_v50 = vld [vmem:[%s3242_s2 + $0xd8] sm:$0xff] }
  0x20   : > { %v275_v45 = vld [vmem:[%s3242_s2 + $0x120] sm:$0xff]  ;;  %v270_v51 = vld [vmem:[%s3242_s2 + $0xf8] sm:$0xff]  ;;  %v284_v52 = vld [vmem:[%s3242_s2 + $0x168] sm:$0xff] }
  0x21   : > { %1932 = vmatprep.subr.bf16.mxu1 %v2766_v46  ;;  %v2787_v53 = vpack.c.bf16 %v270_v51, %v266_v50  ;;  %v265_v54 = vld [vmem:[%s3242_s2 + $0xd0] sm:$0xff]  ;;  %v2796_v56 = vpack.c.bf16 %v275_v45, %v271_v44  ;;  %v274_v57 = vld [vmem:[%s3242_s2 + $0x118] sm:$0xff]  ;;  %v2805_v59 = vpack.c.bf16 %v284_v52, %v280_v48  ;;  %v279_v60 = vld [vmem:[%s3242_s2 + $0x140] sm:$0xff] }
  0x22   : > { %1902 = vmatpush1.bf16.msra.mxu0 %v2709_v27  ;;  %v269_v55 = vld [vmem:[%s3242_s2 + $0xf0] sm:$0xff]  ;;  %v278_v58 = vld [vmem:[%s3242_s2 + $0x138] sm:$0xff]  ;;  %v283_v61 = vld [vmem:[%s3242_s2 + $0x160] sm:$0xff] }
  0x23   : > { %1904 = vmatprep.subr.bf16.mxu0 %v2722_v31  ;;  %1934 = vmatpush1.bf16.msra.mxu1 %v2775_v49  ;;  %v288_v62 = vld [vmem:[%s3242_s2 + $0x188] sm:$0xff]  ;;  %v2817_v63 = vpack.c.bf16 %v269_v55, %v265_v54  ;;  %v2823_v1 = vpack.c.bf16 %v278_v58, %v274_v57  ;;  %v273_v2 = vld [vmem:[%s3242_s2 + $0x110] sm:$0xff]  ;;  %v282_v5 = vld [vmem:[%s3242_s2 + $0x158] sm:$0xff]  ;;  %v2838_v7 = vpack.c.bf16 %v283_v61, %v279_v60 }
  0x24   : > { %v292_v0 = vld [vmem:[%s3242_s2 + $0x1a8] sm:$0xff]  ;;  %1936 = vmatprep.subr.bf16.mxu1 %v2787_v53  ;;  %v277_v3 = vld [vmem:[%s3242_s2 + $0x130] sm:$0xff]  ;;  %v286_v6 = vld [vmem:[%s3242_s2 + $0x178] sm:$0xff] }
  0x25   : > { %v2841_v11 = vpack.c.bf16 %v292_v0, %v288_v62  ;;  %v287_v12 = vld [vmem:[%s3242_s2 + $0x180] sm:$0xff]  ;;  %v296_v14 = vld [vmem:[%s3242_s2 + $0x1c8] sm:$0xff]  ;;  %v2853_v16 = vpack.c.bf16 %v277_v3, %v273_v2  ;;  %v2859_v19 = vpack.c.bf16 %v286_v6, %v282_v5  ;;  %v281_v20 = vld [vmem:[%s3242_s2 + $0x150] sm:$0xff] }
  0x26   : > { %1906 = vmatpush1.bf16.msra.mxu0 %v2758_v43  ;;  %v291_v13 = vld [vmem:[%s3242_s2 + $0x1a0] sm:$0xff]  ;;  %v300_v17 = vld [vmem:[%s3242_s2 + $0x1e8] sm:$0xff]  ;;  %v285_v21 = vld [vmem:[%s3242_s2 + $0x170] sm:$0xff] }
  0x27   : > { %1908 = vmatprep.subr.bf16.mxu0 %v2769_v47  ;;  %1938 = vmatpush1.bf16.msra.mxu1 %v2817_v63  ;;  %v290_v22 = vld [vmem:[%s3242_s2 + $0x198] sm:$0xff]  ;;  %v2874_v25 = vpack.c.bf16 %v291_v13, %v287_v12  ;;  %v2877_v28 = vpack.c.bf16 %v300_v17, %v296_v14  ;;  %v295_v29 = vld [vmem:[%s3242_s2 + $0x1c0] sm:$0xff]  ;;  %v2886_v32 = vpack.c.bf16 %v285_v21, %v281_v20  ;;  %v289_v35 = vld [vmem:[%s3242_s2 + $0x190] sm:$0xff] }
  0x28   : > { %1940 = vmatprep.subr.bf16.mxu1 %v2823_v1  ;;  %v294_v24 = vld [vmem:[%s3242_s2 + $0x1b8] sm:$0xff]  ;;  %v299_v30 = vld [vmem:[%s3242_s2 + $0x1e0] sm:$0xff]  ;;  %v293_v36 = vld [vmem:[%s3242_s2 + $0x1b0] sm:$0xff] }
  0x29   : > { %v2889_v33 = vpack.c.bf16 %v294_v24, %v290_v22  ;;  %v298_v37 = vld [vmem:[%s3242_s2 + $0x1d8] sm:$0xff]  ;;  %v2904_v40 = vpack.c.bf16 %v299_v30, %v295_v29  ;;  %v2908_v41 = vpack.c.bf16 %v293_v36, %v289_v35  ;;  %v297_v44 = vld [vmem:[%s3242_s2 + $0x1d0] sm:$0xff]  ;;  %v303_v48 = vld [vmem:[#allocation2] sm:$0xff] }
  0x2a   : > { %1910 = vmatpush1.bf16.msra.mxu0 %v2796_v56  ;;  %v302_v39 = vld [vmem:[%s3242_s2 + $0x1f8] sm:$0xff]  ;;  %v301_v45 = vld [vmem:[%s3242_s2 + $0x1f0] sm:$0xff]  ;;  %v305_v51 = vld [vmem:[%s2627_s21] sm:$0xff] }
  0x2b   : > { %1912 = vmatprep.subr.bf16.mxu0 %v2805_v59  ;;  %1942 = vmatpush1.bf16.msra.mxu1 %v2853_v16  ;;  %v2911_v42 = vpack.c.bf16 %v302_v39, %v298_v37  ;;  %v2921_v50 = vpack.c.bf16 %v301_v45, %v297_v44  ;;  %v306_v52 = vld [vmem:[%s2627_s21 + $0x8] sm:$0xff]  ;;  %v307_v62 = vld [vmem:[%s2627_s21 + $0x10] sm:$0xff]  ;;  %v308_v5 = vld [vmem:[%s2627_s21 + $0x18] sm:$0xff] }
  0x2c   : > { %1944 = vmatprep.subr.bf16.mxu1 %v2859_v19  ;;  %v304_v24 = vld [vmem:[#allocation3] sm:$0xff] }
  0x2e   : > { %1914 = vmatpush1.bf16.msra.mxu0 %v2838_v7 }
  0x2f   : > { %1916 = vmatprep.subr.bf16.mxu0 %v2841_v11  ;;  %1946 = vmatpush1.bf16.msra.mxu1 %v2886_v32 }
  0x30   : > { %1948 = vmatprep.subr.bf16.mxu1 %v2889_v33 }
  0x32   : > { %1918 = vmatpush1.bf16.msra.mxu0 %v2874_v25 }
  0x33   : > { %1920 = vmatprep.subr.bf16.mxu0 %v2877_v28  ;;  %1950 = vmatpush1.bf16.msra.mxu1 %v2908_v41 }
  0x34   : > { %1952 = vmatprep.subr.bf16.mxu1 %v2911_v42 }
  0x36   : > { %1922 = vmatpush1.bf16.msra.mxu0 %v2904_v40 }
  0x37   : > { %1956 = vmatprep.subr.bf16.mxu0 %v2644_v4  ;;  %1954 = vmatpush1.bf16.msra.mxu1 %v2921_v50 }
  0x38   : > { %1988 = vmatprep.subr.bf16.mxu1 %v2698_v23 }
  0x39   : > { %374 = vmatmul.mubr.f32.vlgmr.msra.gmra.mrb[0].mxu0 %v303_v48 }
  0x3a   : > { %1958 = vmatpush1.bf16.msra.mxu0 %v2657_v9  ;;  %550 = vmatprep.mubr.f32.mxu0 %v2582_v8 }
  0x3b   : > { %1960 = vmatprep.subr.bf16.mxu0 %v2659_v10  ;;  %445 = vmatmul.mubr.f32.vlgmr.msra.gmra.mrb[0].mxu1 %v303_v48  ;;  %v479_v48 = vld [vmem:[%s2632_s24] sm:$0xff] }
  0x3c   : > { %1990 = vmatpush1.bf16.msra.mxu1 %v2706_v26  ;;  %621 = vmatprep.mubr.f32.mxu1 %v2582_v8 }
  0x3d   : > { %1992 = vmatprep.subr.bf16.mxu1 %v2731_v34 }
  0x3e   : > { %1962 = vmatpush1.bf16.msra.mxu0 %v2675_v15 }
  0x3f   : > { %1964 = vmatprep.subr.bf16.mxu0 %v2684_v18 }
  0x40   : > { %1994 = vmatpush1.bf16.msra.mxu1 %v2742_v38 }
  0x41   : > { %1996 = vmatprep.subr.bf16.mxu1 %v2766_v46 }
  0x42   : > { %1966 = vmatpush1.bf16.msra.mxu0 %v2709_v27 }
  0x43   : > { %1968 = vmatprep.subr.bf16.mxu0 %v2722_v31 }
  0x44   : > { %1998 = vmatpush1.bf16.msra.mxu1 %v2775_v49 }
  0x45   : > { %2000 = vmatprep.subr.bf16.mxu1 %v2787_v53 }
  0x46   : > { %1970 = vmatpush1.bf16.msra.mxu0 %v2758_v43 }
  0x47   : > { %1972 = vmatprep.subr.bf16.mxu0 %v2769_v47 }
  0x48   : > { %2002 = vmatpush1.bf16.msra.mxu1 %v2817_v63 }
  0x49   : > { %2004 = vmatprep.subr.bf16.mxu1 %v2823_v1 }
  0x4a   : > { %1974 = vmatpush1.bf16.msra.mxu0 %v2796_v56 }
  0x4b   : > { %1976 = vmatprep.subr.bf16.mxu0 %v2805_v59 }
  0x4c   : > { %2006 = vmatpush1.bf16.msra.mxu1 %v2853_v16 }
  0x4d   : > { %2008 = vmatprep.subr.bf16.mxu1 %v2859_v19 }
  0x4e   : > { %1978 = vmatpush1.bf16.msra.mxu0 %v2838_v7 }
  0x4f   : > { %1980 = vmatprep.subr.bf16.mxu0 %v2841_v11 }
  0x50   : > { %2010 = vmatpush1.bf16.msra.mxu1 %v2886_v32 }
  0x51   : > { %2012 = vmatprep.subr.bf16.mxu1 %v2889_v33 }
  0x52   : > { %1982 = vmatpush1.bf16.msra.mxu0 %v2874_v25 }
  0x53   : > { %1984 = vmatprep.subr.bf16.mxu0 %v2877_v28 }
  0x54   : > { %2014 = vmatpush1.bf16.msra.mxu1 %v2908_v41 }
  0x55   : > { %2016 = vmatprep.subr.bf16.mxu1 %v2911_v42 }
  0x56   : > { %1986 = vmatpush1.bf16.msra.mxu0 %v2904_v40 }
  0x57   : > { %2020 = vmatprep.subr.bf16.mxu0 %v2644_v4 }
  0x58   : > { %2018 = vmatpush1.bf16.msra.mxu1 %v2921_v50 }
  0x59   : > { %2052 = vmatprep.subr.bf16.mxu1 %v2698_v23 }
 0x10c   : > { %v375_v54 = vpop.f32.mrb[0].mxu0 }
 0x10d   : > { %v451_v55 = vadd.f32 %v375_v54, %v305_v51  ;;  %v377_v57 = vpop.f32.mrb[1].mxu0  ;;  %v1830_v54 = vld [vmem:[%s2627_s21 + $0x20] sm:$0xff] }
 0x10e   : > { %v452_v58 = vadd.f32 %v377_v57, %v306_v52  ;;  %v446_v0 = vpop.f32.mrb[0].mxu1 }
 0x10f   : > { %v1827_v60 = vmul.f32 -1.442695, %v451_v55  ;;  %v448_v2 = vpop.f32.mrb[1].mxu1  ;;  %v453_v3 = vadd.f32 %v446_v0, %v307_v62  ;;  %v1831_v55 = vld [vmem:[%s2627_s21 + $0x28] sm:$0xff] }
 0x110   : > { %v1828_v61 = vmul.f32 -1.442695, %v452_v58  ;;  %v454_v12 = vadd.f32 %v448_v2, %v308_v5  ;;  %v1832_v5 = vld [vmem:[%s2627_s21 + $0x30] sm:$0xff] }
 0x111   : > { %2429 = vpow2.f32 %v1827_v60  ;;  %v1829_v6 = vmul.f32 -1.442695, %v453_v3 }
 0x112   : > { %2431 = vpow2.f32 %v1828_v61 }
 0x113   : > { %2433 = vpow2.f32 %v1829_v6 }
 0x114   : > { %2435 = vtanh.f32 %v454_v12  ;;  %v1833_v12 = vld [vmem:[%s2627_s21 + $0x38] sm:$0xff] }
 0x11b   : > { %v2430_v13 = vpop.eup %2429 }
 0x11c   : > { %v2432_v14 = vpop.eup %2431  ;;  %v458_v17 = vadd.f32 1.0, %v2430_v13 }
 0x11d   : > { %v464_v20 = vadd.f32 1.0, %v2432_v14  ;;  %v2434_v21 = vpop.eup %2433 }
 0x11e   : > { %2437 = vrcp.f32 %v458_v17  ;;  %v2436_v22 = vpop.eup %2435  ;;  %v470_v30 = vadd.f32 1.0, %v2434_v21 }
 0x11f   : > { %2439 = vrcp.f32 %v464_v20 }
 0x120   : > { %2441 = vrcp.f32 %v470_v30 }
 0x128   : > { %v2438_v29 = vpop.eup %2437 }
 0x129   : > { %v2440_v35 = vpop.eup %2439  ;;  %v475_v36 = vmul.f32 %v2438_v29, %v2436_v22 }
 0x12a   : > { %v474_v37 = vmul.f32 %v2440_v35, %v304_v24  ;;  %v2442_v44 = vpop.eup %2441 }
 0x12c   : > { %v2965_v39 = vadd.f32 %v475_v36, %v474_v37 }
 0x12e   : > { %2443 = vtanh.f32 %v2965_v39 }
 0x138   : > { %v2444_v45 = vpop.eup %2443 }
 0x139   : > { %v478_v51 = vmul.f32 %v2444_v45, %v2442_v44 }
 0x13b   : > { %v480_v52 = vadd.f32 %v479_v48, %v478_v51 }
 0x13d   : > { %551 = vmatmul.mubr.f32.vlgmr.msra.gmra.mrb[2].mxu0 %v480_v52  ;;  %622 = vmatmul.mubr.f32.vlgmr.msra.gmra.mrb[2].mxu1 %v480_v52  ;;  %v1837_v52 = vld [vmem:[%s2632_s24 + $0x8] sm:$0xff] }
 0x13e   : > { %2022 = vmatpush1.bf16.msra.mxu0 %v2657_v9  ;;  %2054 = vmatpush1.bf16.msra.mxu1 %v2706_v26 }
 0x13f   : > { %2024 = vmatprep.subr.bf16.mxu0 %v2659_v10  ;;  %2056 = vmatprep.subr.bf16.mxu1 %v2731_v34 }
 0x140   : > { %728 = vmatprep.mubr.f32.mxu0 %v2582_v8  ;;  %799 = vmatprep.mubr.f32.mxu1 %v2582_v8 }
 0x142   : > { %2026 = vmatpush1.bf16.msra.mxu0 %v2675_v15  ;;  %2058 = vmatpush1.bf16.msra.mxu1 %v2742_v38 }
 0x143   : > { %2028 = vmatprep.subr.bf16.mxu0 %v2684_v18  ;;  %2060 = vmatprep.subr.bf16.mxu1 %v2766_v46 }
 0x146   : > { %2030 = vmatpush1.bf16.msra.mxu0 %v2709_v27  ;;  %2062 = vmatpush1.bf16.msra.mxu1 %v2775_v49 }
 0x147   : > { %2032 = vmatprep.subr.bf16.mxu0 %v2722_v31  ;;  %2064 = vmatprep.subr.bf16.mxu1 %v2787_v53 }
 0x14a   : > { %2034 = vmatpush1.bf16.msra.mxu0 %v2758_v43  ;;  %2066 = vmatpush1.bf16.msra.mxu1 %v2817_v63 }
 0x14b   : > { %2036 = vmatprep.subr.bf16.mxu0 %v2769_v47  ;;  %2068 = vmatprep.subr.bf16.mxu1 %v2823_v1 }
 0x14e   : > { %2038 = vmatpush1.bf16.msra.mxu0 %v2796_v56  ;;  %2070 = vmatpush1.bf16.msra.mxu1 %v2853_v16 }
 0x14f   : > { %2040 = vmatprep.subr.bf16.mxu0 %v2805_v59  ;;  %2072 = vmatprep.subr.bf16.mxu1 %v2859_v19 }
 0x152   : > { %2042 = vmatpush1.bf16.msra.mxu0 %v2838_v7  ;;  %2074 = vmatpush1.bf16.msra.mxu1 %v2886_v32 }
 0x153   : > { %2044 = vmatprep.subr.bf16.mxu0 %v2841_v11  ;;  %2076 = vmatprep.subr.bf16.mxu1 %v2889_v33 }
 0x156   : > { %2046 = vmatpush1.bf16.msra.mxu0 %v2874_v25  ;;  %2078 = vmatpush1.bf16.msra.mxu1 %v2908_v41 }
 0x157   : > { %2048 = vmatprep.subr.bf16.mxu0 %v2877_v28  ;;  %2080 = vmatprep.subr.bf16.mxu1 %v2911_v42 }
 0x15a   : > { %2050 = vmatpush1.bf16.msra.mxu0 %v2904_v40  ;;  %2082 = vmatpush1.bf16.msra.mxu1 %v2921_v50 }
 0x15b   : > { %2084 = vmatprep.subr.bf16.mxu0 %v2644_v4  ;;  %2116 = vmatprep.subr.bf16.mxu1 %v2698_v23 }
 0x210   : > { %v552_v57 = vpop.f32.mrb[2].mxu0  ;;  %v623_v58 = vpop.f32.mrb[2].mxu1 }
 0x211   : > { %v628_v60 = vadd.f32 %v1830_v54, %v552_v57  ;;  %v554_v61 = vpop.f32.mrb[3].mxu0  ;;  %v625_v62 = vpop.f32.mrb[3].mxu1  ;;  %v630_v6 = vadd.f32 %v1832_v5, %v623_v58  ;;  %v1839_v57 = vld [vmem:[%s2627_s21 + $0x48] sm:$0xff] }
 0x212   : > { %v629_v0 = vadd.f32 %v1831_v55, %v554_v61  ;;  %v631_v13 = vadd.f32 %v1833_v12, %v625_v62 }
 0x213   : > { %v1834_v2 = vmul.f32 -1.442695, %v628_v60  ;;  %v1836_v14 = vmul.f32 -1.442695, %v630_v6  ;;  %v1840_v6 = vld [vmem:[%s2627_s21 + $0x50] sm:$0xff] }
 0x214   : > { %v1835_v3 = vmul.f32 -1.442695, %v629_v0 }
 0x215   : > { %2445 = vpow2.f32 %v1834_v2 }
 0x216   : > { %2447 = vpow2.f32 %v1835_v3 }
 0x217   : > { %2449 = vtanh.f32 %v631_v13  ;;  %v1841_v13 = vld [vmem:[%s2627_s21 + $0x58] sm:$0xff] }
 0x218   : > { %2451 = vpow2.f32 %v1836_v14 }
 0x21f   : > { %v2446_v17 = vpop.eup %2445 }
 0x220   : > { %v635_v20 = vadd.f32 1.0, %v2446_v17  ;;  %v2448_v21 = vpop.eup %2447 }
 0x221   : > { %v641_v22 = vadd.f32 1.0, %v2448_v21  ;;  %v2450_v24 = vpop.eup %2449 }
 0x222   : > { %2453 = vrcp.f32 %v635_v20  ;;  %v2452_v29 = vpop.eup %2451 }
 0x223   : > { %2455 = vrcp.f32 %v641_v22  ;;  %v647_v37 = vadd.f32 1.0, %v2452_v29 }
 0x225   : > { %2457 = vrcp.f32 %v647_v37 }
 0x22c   : > { %v2454_v30 = vpop.eup %2453 }
 0x22d   : > { %v652_v35 = vmul.f32 %v2454_v30, %v2450_v24  ;;  %v2456_v36 = vpop.eup %2455 }
 0x22e   : > { %v651_v44 = vmul.f32 %v2456_v36, %v2965_v39  ;;  %v1838_v39 = vld [vmem:[%s2627_s21 + $0x40] sm:$0xff] }
 0x22f   : > { %v2458_v48 = vpop.eup %2457 }
 0x230   : > { %v3008_v45 = vadd.f32 %v652_v35, %v651_v44 }
 0x232   : > { %2459 = vtanh.f32 %v3008_v45 }
 0x23c   : > { %v2460_v51 = vpop.eup %2459 }
 0x23d   : > { %v655_v54 = vmul.f32 %v2460_v51, %v2458_v48 }
 0x23f   : > { %v658_v55 = vadd.f32 %v1837_v52, %v655_v54 }
 0x241   : > { %729 = vmatmul.mubr.f32.vlgmr.msra.gmra.mrb[4].mxu0 %v658_v55  ;;  %800 = vmatmul.mubr.f32.vlgmr.msra.gmra.mrb[4].mxu1 %v658_v55  ;;  %v1845_v55 = vld [vmem:[%s2632_s24 + $0x10] sm:$0xff] }
 0x242   : > { %2086 = vmatpush1.bf16.msra.mxu0 %v2657_v9  ;;  %2118 = vmatpush1.bf16.msra.mxu1 %v2706_v26 }
 0x243   : > { %2088 = vmatprep.subr.bf16.mxu0 %v2659_v10  ;;  %2120 = vmatprep.subr.bf16.mxu1 %v2731_v34 }
 0x244   : > { %906 = vmatprep.mubr.f32.mxu0 %v2582_v8  ;;  %977 = vmatprep.mubr.f32.mxu1 %v2582_v8 }
 0x246   : > { %2090 = vmatpush1.bf16.msra.mxu0 %v2675_v15  ;;  %2122 = vmatpush1.bf16.msra.mxu1 %v2742_v38 }
 0x247   : > { %2092 = vmatprep.subr.bf16.mxu0 %v2684_v18  ;;  %2124 = vmatprep.subr.bf16.mxu1 %v2766_v46 }
 0x24a   : > { %2094 = vmatpush1.bf16.msra.mxu0 %v2709_v27  ;;  %2126 = vmatpush1.bf16.msra.mxu1 %v2775_v49 }
 0x24b   : > { %2096 = vmatprep.subr.bf16.mxu0 %v2722_v31  ;;  %2128 = vmatprep.subr.bf16.mxu1 %v2787_v53 }
 0x24e   : > { %2098 = vmatpush1.bf16.msra.mxu0 %v2758_v43  ;;  %2130 = vmatpush1.bf16.msra.mxu1 %v2817_v63 }
 0x24f   : > { %2100 = vmatprep.subr.bf16.mxu0 %v2769_v47  ;;  %2132 = vmatprep.subr.bf16.mxu1 %v2823_v1 }
 0x252   : > { %2102 = vmatpush1.bf16.msra.mxu0 %v2796_v56  ;;  %2134 = vmatpush1.bf16.msra.mxu1 %v2853_v16 }
 0x253   : > { %2104 = vmatprep.subr.bf16.mxu0 %v2805_v59  ;;  %2136 = vmatprep.subr.bf16.mxu1 %v2859_v19 }
 0x256   : > { %2106 = vmatpush1.bf16.msra.mxu0 %v2838_v7  ;;  %2138 = vmatpush1.bf16.msra.mxu1 %v2886_v32 }
 0x257   : > { %2108 = vmatprep.subr.bf16.mxu0 %v2841_v11  ;;  %2140 = vmatprep.subr.bf16.mxu1 %v2889_v33 }
 0x25a   : > { %2110 = vmatpush1.bf16.msra.mxu0 %v2874_v25  ;;  %2142 = vmatpush1.bf16.msra.mxu1 %v2908_v41 }
 0x25b   : > { %2112 = vmatprep.subr.bf16.mxu0 %v2877_v28  ;;  %2144 = vmatprep.subr.bf16.mxu1 %v2911_v42 }
 0x25e   : > { %2114 = vmatpush1.bf16.msra.mxu0 %v2904_v40  ;;  %2146 = vmatpush1.bf16.msra.mxu1 %v2921_v50 }
 0x25f   : > { %2148 = vmatprep.subr.bf16.mxu0 %v2644_v4  ;;  %2180 = vmatprep.subr.bf16.mxu1 %v2698_v23 }
 0x314   : > { %v730_v58 = vpop.f32.mrb[4].mxu0  ;;  %v801_v60 = vpop.f32.mrb[4].mxu1 }
 0x315   : > { %v806_v61 = vadd.f32 %v1838_v39, %v730_v58  ;;  %v732_v62 = vpop.f32.mrb[5].mxu0  ;;  %v803_v0 = vpop.f32.mrb[5].mxu1  ;;  %v808_v12 = vadd.f32 %v1840_v6, %v801_v60  ;;  %v1847_v58 = vld [vmem:[%s2627_s21 + $0x68] sm:$0xff] }
 0x316   : > { %v807_v2 = vadd.f32 %v1839_v57, %v732_v62  ;;  %v809_v14 = vadd.f32 %v1841_v13, %v803_v0 }
 0x317   : > { %v1842_v3 = vmul.f32 -1.442695, %v806_v61  ;;  %v1844_v17 = vmul.f32 -1.442695, %v808_v12  ;;  %v1848_v12 = vld [vmem:[%s2627_s21 + $0x70] sm:$0xff] }
 0x318   : > { %v1843_v5 = vmul.f32 -1.442695, %v807_v2 }
 0x319   : > { %2461 = vpow2.f32 %v1842_v3 }
 0x31a   : > { %2463 = vpow2.f32 %v1843_v5 }
 0x31b   : > { %2465 = vtanh.f32 %v809_v14  ;;  %v1849_v14 = vld [vmem:[%s2627_s21 + $0x78] sm:$0xff] }
 0x31c   : > { %2467 = vpow2.f32 %v1844_v17 }
 0x323   : > { %v2462_v20 = vpop.eup %2461 }
 0x324   : > { %v813_v21 = vadd.f32 1.0, %v2462_v20  ;;  %v2464_v22 = vpop.eup %2463 }
 0x325   : > { %v819_v24 = vadd.f32 1.0, %v2464_v22  ;;  %v2466_v29 = vpop.eup %2465 }
 0x326   : > { %2469 = vrcp.f32 %v813_v21  ;;  %v2468_v30 = vpop.eup %2467 }
 0x327   : > { %2471 = vrcp.f32 %v819_v24  ;;  %v825_v44 = vadd.f32 1.0, %v2468_v30 }
 0x329   : > { %2473 = vrcp.f32 %v825_v44 }
 0x330   : > { %v2470_v35 = vpop.eup %2469 }
 0x331   : > { %v830_v36 = vmul.f32 %v2470_v35, %v2466_v29  ;;  %v2472_v37 = vpop.eup %2471 }
 0x332   : > { %v829_v48 = vmul.f32 %v2472_v37, %v3008_v45  ;;  %v1846_v45 = vld [vmem:[%s2627_s21 + $0x60] sm:$0xff] }
 0x333   : > { %v2474_v52 = vpop.eup %2473 }
 0x334   : > { %v3051_v51 = vadd.f32 %v830_v36, %v829_v48 }
 0x336   : > { %2475 = vtanh.f32 %v3051_v51 }
 0x340   : > { %v2476_v54 = vpop.eup %2475 }
 0x341   : > { %v833_v39 = vmul.f32 %v2476_v54, %v2474_v52 }
 0x343   : > { %v836_v57 = vadd.f32 %v1845_v55, %v833_v39 }
 0x345   : > { %907 = vmatmul.mubr.f32.vlgmr.msra.gmra.mrb[6].mxu0 %v836_v57  ;;  %978 = vmatmul.mubr.f32.vlgmr.msra.gmra.mrb[6].mxu1 %v836_v57  ;;  %v1853_v57 = vld [vmem:[%s2632_s24 + $0x18] sm:$0xff] }
 0x346   : > { %2150 = vmatpush1.bf16.msra.mxu0 %v2657_v9  ;;  %2182 = vmatpush1.bf16.msra.mxu1 %v2706_v26 }
 0x347   : > { %2152 = vmatprep.subr.bf16.mxu0 %v2659_v10  ;;  %2184 = vmatprep.subr.bf16.mxu1 %v2731_v34 }
 0x348   : > { %1084 = vmatprep.mubr.f32.mxu0 %v2582_v8  ;;  %1155 = vmatprep.mubr.f32.mxu1 %v2582_v8 }
 0x34a   : > { %2154 = vmatpush1.bf16.msra.mxu0 %v2675_v15  ;;  %2186 = vmatpush1.bf16.msra.mxu1 %v2742_v38 }
 0x34b   : > { %2156 = vmatprep.subr.bf16.mxu0 %v2684_v18  ;;  %2188 = vmatprep.subr.bf16.mxu1 %v2766_v46 }
 0x34e   : > { %2158 = vmatpush1.bf16.msra.mxu0 %v2709_v27  ;;  %2190 = vmatpush1.bf16.msra.mxu1 %v2775_v49 }
 0x34f   : > { %2160 = vmatprep.subr.bf16.mxu0 %v2722_v31  ;;  %2192 = vmatprep.subr.bf16.mxu1 %v2787_v53 }
 0x352   : > { %2162 = vmatpush1.bf16.msra.mxu0 %v2758_v43  ;;  %2194 = vmatpush1.bf16.msra.mxu1 %v2817_v63 }
 0x353   : > { %2164 = vmatprep.subr.bf16.mxu0 %v2769_v47  ;;  %2196 = vmatprep.subr.bf16.mxu1 %v2823_v1 }
 0x356   : > { %2166 = vmatpush1.bf16.msra.mxu0 %v2796_v56  ;;  %2198 = vmatpush1.bf16.msra.mxu1 %v2853_v16 }
 0x357   : > { %2168 = vmatprep.subr.bf16.mxu0 %v2805_v59  ;;  %2200 = vmatprep.subr.bf16.mxu1 %v2859_v19 }
 0x35a   : > { %2170 = vmatpush1.bf16.msra.mxu0 %v2838_v7  ;;  %2202 = vmatpush1.bf16.msra.mxu1 %v2886_v32 }
 0x35b   : > { %2172 = vmatprep.subr.bf16.mxu0 %v2841_v11  ;;  %2204 = vmatprep.subr.bf16.mxu1 %v2889_v33 }
 0x35e   : > { %2174 = vmatpush1.bf16.msra.mxu0 %v2874_v25  ;;  %2206 = vmatpush1.bf16.msra.mxu1 %v2908_v41 }
 0x35f   : > { %2176 = vmatprep.subr.bf16.mxu0 %v2877_v28  ;;  %2208 = vmatprep.subr.bf16.mxu1 %v2911_v42 }
 0x362   : > { %2178 = vmatpush1.bf16.msra.mxu0 %v2904_v40  ;;  %2210 = vmatpush1.bf16.msra.mxu1 %v2921_v50 }
 0x363   : > { %2212 = vmatprep.subr.bf16.mxu0 %v2644_v4  ;;  %2244 = vmatprep.subr.bf16.mxu1 %v2698_v23 }
 0x418   : > { %v908_v60 = vpop.f32.mrb[6].mxu0  ;;  %v979_v61 = vpop.f32.mrb[6].mxu1 }
 0x419   : > { %v984_v62 = vadd.f32 %v1846_v45, %v908_v60  ;;  %v910_v0 = vpop.f32.mrb[7].mxu0  ;;  %v981_v2 = vpop.f32.mrb[7].mxu1  ;;  %v986_v13 = vadd.f32 %v1848_v12, %v979_v61  ;;  %v1855_v60 = vld [vmem:[%s2627_s21 + $0x88] sm:$0xff] }
 0x41a   : > { %v985_v3 = vadd.f32 %v1847_v58, %v910_v0  ;;  %v987_v17 = vadd.f32 %v1849_v14, %v981_v2 }
 0x41b   : > { %v1850_v5 = vmul.f32 -1.442695, %v984_v62  ;;  %v1852_v20 = vmul.f32 -1.442695, %v986_v13  ;;  %v1856_v13 = vld [vmem:[%s2627_s21 + $0x90] sm:$0xff] }
 0x41c   : > { %v1851_v6 = vmul.f32 -1.442695, %v985_v3 }
 0x41d   : > { %2477 = vpow2.f32 %v1850_v5 }
 0x41e   : > { %2479 = vpow2.f32 %v1851_v6 }
 0x41f   : > { %2481 = vtanh.f32 %v987_v17  ;;  %v1857_v17 = vld [vmem:[%s2627_s21 + $0x98] sm:$0xff] }
 0x420   : > { %2483 = vpow2.f32 %v1852_v20 }
 0x427   : > { %v2478_v21 = vpop.eup %2477 }
 0x428   : > { %v991_v22 = vadd.f32 1.0, %v2478_v21  ;;  %v2480_v24 = vpop.eup %2479 }
 0x429   : > { %v997_v29 = vadd.f32 1.0, %v2480_v24  ;;  %v2482_v30 = vpop.eup %2481 }
 0x42a   : > { %2485 = vrcp.f32 %v991_v22  ;;  %v2484_v35 = vpop.eup %2483 }
 0x42b   : > { %2487 = vrcp.f32 %v997_v29  ;;  %v1003_v48 = vadd.f32 1.0, %v2484_v35 }
 0x42d   : > { %2489 = vrcp.f32 %v1003_v48 }
 0x434   : > { %v2486_v36 = vpop.eup %2485 }
 0x435   : > { %v1008_v37 = vmul.f32 %v2486_v36, %v2482_v30  ;;  %v2488_v44 = vpop.eup %2487 }
 0x436   : > { %v1007_v52 = vmul.f32 %v2488_v44, %v3051_v51  ;;  %v1854_v51 = vld [vmem:[%s2627_s21 + $0x80] sm:$0xff] }
 0x437   : > { %v2490_v55 = vpop.eup %2489 }
 0x438   : > { %v3094_v54 = vadd.f32 %v1008_v37, %v1007_v52 }
 0x43a   : > { %2491 = vtanh.f32 %v3094_v54 }
 0x444   : > { %v2492_v39 = vpop.eup %2491 }
 0x445   : > { %v1011_v45 = vmul.f32 %v2492_v39, %v2490_v55 }
 0x447   : > { %v1014_v58 = vadd.f32 %v1853_v57, %v1011_v45 }
 0x449   : > { %1085 = vmatmul.mubr.f32.vlgmr.msra.gmra.mrb[8].mxu0 %v1014_v58  ;;  %1156 = vmatmul.mubr.f32.vlgmr.msra.gmra.mrb[8].mxu1 %v1014_v58  ;;  %v1861_v58 = vld [vmem:[%s2632_s24 + $0x20] sm:$0xff] }
 0x44a   : > { %2214 = vmatpush1.bf16.msra.mxu0 %v2657_v9  ;;  %2246 = vmatpush1.bf16.msra.mxu1 %v2706_v26 }
 0x44b   : > { %2216 = vmatprep.subr.bf16.mxu0 %v2659_v10  ;;  %2248 = vmatprep.subr.bf16.mxu1 %v2731_v34 }
 0x44c   : > { %1262 = vmatprep.mubr.f32.mxu0 %v2582_v8  ;;  %1333 = vmatprep.mubr.f32.mxu1 %v2582_v8 }
 0x44e   : > { %2218 = vmatpush1.bf16.msra.mxu0 %v2675_v15  ;;  %2250 = vmatpush1.bf16.msra.mxu1 %v2742_v38 }
 0x44f   : > { %2220 = vmatprep.subr.bf16.mxu0 %v2684_v18  ;;  %2252 = vmatprep.subr.bf16.mxu1 %v2766_v46 }
 0x452   : > { %2222 = vmatpush1.bf16.msra.mxu0 %v2709_v27  ;;  %2254 = vmatpush1.bf16.msra.mxu1 %v2775_v49 }
 0x453   : > { %2224 = vmatprep.subr.bf16.mxu0 %v2722_v31  ;;  %2256 = vmatprep.subr.bf16.mxu1 %v2787_v53 }
 0x456   : > { %2226 = vmatpush1.bf16.msra.mxu0 %v2758_v43  ;;  %2258 = vmatpush1.bf16.msra.mxu1 %v2817_v63 }
 0x457   : > { %2228 = vmatprep.subr.bf16.mxu0 %v2769_v47  ;;  %2260 = vmatprep.subr.bf16.mxu1 %v2823_v1 }
 0x45a   : > { %2230 = vmatpush1.bf16.msra.mxu0 %v2796_v56  ;;  %2262 = vmatpush1.bf16.msra.mxu1 %v2853_v16 }
 0x45b   : > { %2232 = vmatprep.subr.bf16.mxu0 %v2805_v59  ;;  %2264 = vmatprep.subr.bf16.mxu1 %v2859_v19 }
 0x45e   : > { %2234 = vmatpush1.bf16.msra.mxu0 %v2838_v7  ;;  %2266 = vmatpush1.bf16.msra.mxu1 %v2886_v32 }
 0x45f   : > { %2236 = vmatprep.subr.bf16.mxu0 %v2841_v11  ;;  %2268 = vmatprep.subr.bf16.mxu1 %v2889_v33 }
 0x462   : > { %2238 = vmatpush1.bf16.msra.mxu0 %v2874_v25  ;;  %2270 = vmatpush1.bf16.msra.mxu1 %v2908_v41 }
 0x463   : > { %2240 = vmatprep.subr.bf16.mxu0 %v2877_v28  ;;  %2272 = vmatprep.subr.bf16.mxu1 %v2911_v42 }
 0x466   : > { %2242 = vmatpush1.bf16.msra.mxu0 %v2904_v40  ;;  %2274 = vmatpush1.bf16.msra.mxu1 %v2921_v50 }
 0x467   : > { %2276 = vmatprep.subr.bf16.mxu0 %v2644_v4  ;;  %2308 = vmatprep.subr.bf16.mxu1 %v2698_v23 }
 0x51c   : > { %v1086_v61 = vpop.f32.mrb[8].mxu0  ;;  %v1157_v62 = vpop.f32.mrb[8].mxu1 }
 0x51d   : > { %v1162_v0 = vadd.f32 %v1854_v51, %v1086_v61  ;;  %v1088_v2 = vpop.f32.mrb[9].mxu0  ;;  %v1159_v3 = vpop.f32.mrb[9].mxu1  ;;  %v1164_v14 = vadd.f32 %v1856_v13, %v1157_v62  ;;  %v1863_v61 = vld [vmem:[%s2627_s21 + $0xa8] sm:$0xff] }
 0x51e   : > { %v1163_v5 = vadd.f32 %v1855_v60, %v1088_v2  ;;  %v1165_v20 = vadd.f32 %v1857_v17, %v1159_v3 }
 0x51f   : > { %v1858_v6 = vmul.f32 -1.442695, %v1162_v0  ;;  %v1860_v21 = vmul.f32 -1.442695, %v1164_v14  ;;  %v1864_v14 = vld [vmem:[%s2627_s21 + $0xb0] sm:$0xff] }
 0x520   : > { %v1859_v12 = vmul.f32 -1.442695, %v1163_v5 }
 0x521   : > { %2493 = vpow2.f32 %v1858_v6 }
 0x522   : > { %2495 = vpow2.f32 %v1859_v12 }
 0x523   : > { %2497 = vtanh.f32 %v1165_v20  ;;  %v1865_v20 = vld [vmem:[%s2627_s21 + $0xb8] sm:$0xff] }
 0x524   : > { %2499 = vpow2.f32 %v1860_v21 }
 0x52b   : > { %v2494_v22 = vpop.eup %2493 }
 0x52c   : > { %v1169_v24 = vadd.f32 1.0, %v2494_v22  ;;  %v2496_v29 = vpop.eup %2495 }
 0x52d   : > { %v1175_v30 = vadd.f32 1.0, %v2496_v29  ;;  %v2498_v35 = vpop.eup %2497 }
 0x52e   : > { %2501 = vrcp.f32 %v1169_v24  ;;  %v2500_v36 = vpop.eup %2499 }
 0x52f   : > { %2503 = vrcp.f32 %v1175_v30  ;;  %v1181_v52 = vadd.f32 1.0, %v2500_v36 }
 0x531   : > { %2505 = vrcp.f32 %v1181_v52 }
 0x538   : > { %v2502_v37 = vpop.eup %2501 }
 0x539   : > { %v1186_v44 = vmul.f32 %v2502_v37, %v2498_v35  ;;  %v2504_v48 = vpop.eup %2503 }
 0x53a   : > { %v1185_v55 = vmul.f32 %v2504_v48, %v3094_v54  ;;  %v1862_v54 = vld [vmem:[%s2627_s21 + $0xa0] sm:$0xff] }
 0x53b   : > { %v2506_v57 = vpop.eup %2505 }
 0x53c   : > { %v3137_v39 = vadd.f32 %v1186_v44, %v1185_v55 }
 0x53e   : > { %2507 = vtanh.f32 %v3137_v39 }
 0x548   : > { %v2508_v45 = vpop.eup %2507 }
 0x549   : > { %v1189_v51 = vmul.f32 %v2508_v45, %v2506_v57 }
 0x54b   : > { %v1192_v60 = vadd.f32 %v1861_v58, %v1189_v51  ;;  %v1869_v58 = vld [vmem:[%s2632_s24 + $0x28] sm:$0xff] }
 0x54d   : > { %1263 = vmatmul.mubr.f32.vlgmr.msra.gmra.mrb[10].mxu0 %v1192_v60  ;;  %1334 = vmatmul.mubr.f32.vlgmr.msra.gmra.mrb[10].mxu1 %v1192_v60 }
 0x54e   : > { %2278 = vmatpush1.bf16.msra.mxu0 %v2657_v9  ;;  %2310 = vmatpush1.bf16.msra.mxu1 %v2706_v26 }
 0x54f   : > { %2280 = vmatprep.subr.bf16.mxu0 %v2659_v10  ;;  %2312 = vmatprep.subr.bf16.mxu1 %v2731_v34 }
 0x550   : > { %1440 = vmatprep.mubr.f32.mxu0 %v2582_v8  ;;  %1511 = vmatprep.mubr.f32.mxu1 %v2582_v8 }
 0x552   : > { %2282 = vmatpush1.bf16.msra.mxu0 %v2675_v15  ;;  %2314 = vmatpush1.bf16.msra.mxu1 %v2742_v38 }
 0x553   : > { %2284 = vmatprep.subr.bf16.mxu0 %v2684_v18  ;;  %2316 = vmatprep.subr.bf16.mxu1 %v2766_v46 }
 0x556   : > { %2286 = vmatpush1.bf16.msra.mxu0 %v2709_v27  ;;  %2318 = vmatpush1.bf16.msra.mxu1 %v2775_v49 }
 0x557   : > { %2288 = vmatprep.subr.bf16.mxu0 %v2722_v31  ;;  %2320 = vmatprep.subr.bf16.mxu1 %v2787_v53 }
 0x55a   : > { %2290 = vmatpush1.bf16.msra.mxu0 %v2758_v43  ;;  %2322 = vmatpush1.bf16.msra.mxu1 %v2817_v63 }
 0x55b   : > { %2292 = vmatprep.subr.bf16.mxu0 %v2769_v47  ;;  %2324 = vmatprep.subr.bf16.mxu1 %v2823_v1 }
 0x55e   : > { %2294 = vmatpush1.bf16.msra.mxu0 %v2796_v56  ;;  %2326 = vmatpush1.bf16.msra.mxu1 %v2853_v16 }
 0x55f   : > { %2296 = vmatprep.subr.bf16.mxu0 %v2805_v59  ;;  %2328 = vmatprep.subr.bf16.mxu1 %v2859_v19 }
 0x562   : > { %2298 = vmatpush1.bf16.msra.mxu0 %v2838_v7  ;;  %2330 = vmatpush1.bf16.msra.mxu1 %v2886_v32 }
 0x563   : > { %2300 = vmatprep.subr.bf16.mxu0 %v2841_v11  ;;  %2332 = vmatprep.subr.bf16.mxu1 %v2889_v33 }
 0x566   : > { %2302 = vmatpush1.bf16.msra.mxu0 %v2874_v25  ;;  %2334 = vmatpush1.bf16.msra.mxu1 %v2908_v41 }
 0x567   : > { %2304 = vmatprep.subr.bf16.mxu0 %v2877_v28  ;;  %2336 = vmatprep.subr.bf16.mxu1 %v2911_v42 }
 0x56a   : > { %2306 = vmatpush1.bf16.msra.mxu0 %v2904_v40  ;;  %2338 = vmatpush1.bf16.msra.mxu1 %v2921_v50 }
 0x56b   : > { %2340 = vmatprep.subr.bf16.mxu0 %v2644_v4  ;;  %2372 = vmatprep.subr.bf16.mxu1 %v2698_v23 }
 0x620   : > { %v1264_v62 = vpop.f32.mrb[10].mxu0  ;;  %v1335_v0 = vpop.f32.mrb[10].mxu1 }
 0x621   : > { %v1340_v2 = vadd.f32 %v1862_v54, %v1264_v62  ;;  %v1266_v3 = vpop.f32.mrb[11].mxu0  ;;  %v1337_v5 = vpop.f32.mrb[11].mxu1  ;;  %v1342_v17 = vadd.f32 %v1864_v14, %v1335_v0  ;;  %v1878_v54 = vld [vmem:[%s2627_s21 + $0xe0] sm:$0xff]  ;;  %v1880_v14 = vld [vmem:[%s2627_s21 + $0xf0] sm:$0xff] }
 0x622   : > { %v1341_v6 = vadd.f32 %v1863_v61, %v1266_v3  ;;  %v1343_v21 = vadd.f32 %v1865_v20, %v1337_v5  ;;  %v1879_v61 = vld [vmem:[%s2627_s21 + $0xe8] sm:$0xff]  ;;  %v1881_v20 = vld [vmem:[%s2627_s21 + $0xf8] sm:$0xff] }
 0x623   : > { %v1866_v12 = vmul.f32 -1.442695, %v1340_v2  ;;  %v1868_v4 = vmul.f32 -1.442695, %v1342_v17 }
 0x624   : > { %v1867_v13 = vmul.f32 -1.442695, %v1341_v6 }
 0x625   : > { %2509 = vpow2.f32 %v1866_v12 }
 0x626   : > { %2511 = vpow2.f32 %v1867_v13 }
 0x627   : > { %2513 = vtanh.f32 %v1343_v21 }
 0x628   : > { %2515 = vpow2.f32 %v1868_v4 }
 0x62f   : > { %v2510_v22 = vpop.eup %2509 }
 0x630   : > { %v1347_v24 = vadd.f32 1.0, %v2510_v22  ;;  %v2512_v23 = vpop.eup %2511 }
 0x631   : > { %v1353_v29 = vadd.f32 1.0, %v2512_v23  ;;  %v2514_v30 = vpop.eup %2513 }
 0x632   : > { %2517 = vrcp.f32 %v1347_v24  ;;  %v2516_v35 = vpop.eup %2515 }
 0x633   : > { %2519 = vrcp.f32 %v1353_v29  ;;  %v1359_v48 = vadd.f32 1.0, %v2516_v35 }
 0x635   : > { %2521 = vrcp.f32 %v1359_v48 }
 0x63c   : > { %v2518_v36 = vpop.eup %2517 }
 0x63d   : > { %v1364_v37 = vmul.f32 %v2518_v36, %v2514_v30  ;;  %v2520_v44 = vpop.eup %2519 }
 0x63e   : > { %v1363_v52 = vmul.f32 %v2520_v44, %v3137_v39 }
 0x63f   : > { %v2522_v57 = vpop.eup %2521 }
 0x640   : > { %v3180_v55 = vadd.f32 %v1364_v37, %v1363_v52 }
 0x642   : > { %2523 = vtanh.f32 %v3180_v55 }
 0x64c   : > { %v2524_v45 = vpop.eup %2523 }
 0x64d   : > { %v1367_v51 = vmul.f32 %v2524_v45, %v2522_v57 }
 0x64f   : > { %v1370_v60 = vadd.f32 %v1869_v58, %v1367_v51  ;;  %v1885_v58 = vld [vmem:[%s2632_s24 + $0x38] sm:$0xff] }
 0x651   : > { %1441 = vmatmul.mubr.f32.vlgmr.msra.gmra.mrb[12].mxu0 %v1370_v60  ;;  %1512 = vmatmul.mubr.f32.vlgmr.msra.gmra.mrb[12].mxu1 %v1370_v60 }
 0x652   : > { %2342 = vmatpush1.bf16.msra.mxu0 %v2657_v9  ;;  %2374 = vmatpush1.bf16.msra.mxu1 %v2706_v26  ;;  %v1871_v9 = vld [vmem:[%s2627_s21 + $0xc8] sm:$0xff] }
 0x653   : > { %2344 = vmatprep.subr.bf16.mxu0 %v2659_v10  ;;  %2376 = vmatprep.subr.bf16.mxu1 %v2731_v34 }
 0x654   : > { %1618 = vmatprep.mubr.f32.mxu0 %v2582_v8  ;;  %1689 = vmatprep.mubr.f32.mxu1 %v2582_v8  ;;  %v1870_v8 = vld [vmem:[%s2627_s21 + $0xc0] sm:$0xff] }
 0x656   : > { %2346 = vmatpush1.bf16.msra.mxu0 %v2675_v15  ;;  %2378 = vmatpush1.bf16.msra.mxu1 %v2742_v38 }
 0x657   : > { %2348 = vmatprep.subr.bf16.mxu0 %v2684_v18  ;;  %2380 = vmatprep.subr.bf16.mxu1 %v2766_v46 }
 0x65a   : > { %2350 = vmatpush1.bf16.msra.mxu0 %v2709_v27  ;;  %2382 = vmatpush1.bf16.msra.mxu1 %v2775_v49 }
 0x65b   : > { %2352 = vmatprep.subr.bf16.mxu0 %v2722_v31  ;;  %2384 = vmatprep.subr.bf16.mxu1 %v2787_v53 }
 0x65e   : > { %2354 = vmatpush1.bf16.msra.mxu0 %v2758_v43  ;;  %2386 = vmatpush1.bf16.msra.mxu1 %v2817_v63  ;;  %v1872_v43 = vld [vmem:[%s2627_s21 + $0xd0] sm:$0xff] }
 0x65f   : > { %2356 = vmatprep.subr.bf16.mxu0 %v2769_v47  ;;  %2388 = vmatprep.subr.bf16.mxu1 %v2823_v1  ;;  %v1873_v47 = vld [vmem:[%s2627_s21 + $0xd8] sm:$0xff] }
 0x662   : > { %2358 = vmatpush1.bf16.msra.mxu0 %v2796_v56  ;;  %2390 = vmatpush1.bf16.msra.mxu1 %v2853_v16 }
 0x663   : > { %2360 = vmatprep.subr.bf16.mxu0 %v2805_v59  ;;  %2392 = vmatprep.subr.bf16.mxu1 %v2859_v19 }
 0x666   : > { %2362 = vmatpush1.bf16.msra.mxu0 %v2838_v7  ;;  %2394 = vmatpush1.bf16.msra.mxu1 %v2886_v32 }
 0x667   : > { %2364 = vmatprep.subr.bf16.mxu0 %v2841_v11  ;;  %2396 = vmatprep.subr.bf16.mxu1 %v2889_v33 }
 0x66a   : > { %2366 = vmatpush1.bf16.msra.mxu0 %v2874_v25  ;;  %2398 = vmatpush1.bf16.msra.mxu1 %v2908_v41 }
 0x66b   : > { %2368 = vmatprep.subr.bf16.mxu0 %v2877_v28  ;;  %2400 = vmatprep.subr.bf16.mxu1 %v2911_v42  ;;  %v1877_v42 = vld [vmem:[%s2632_s24 + $0x30] sm:$0xff] }
 0x66e   : > { %2370 = vmatpush1.bf16.msra.mxu0 %v2904_v40  ;;  %2402 = vmatpush1.bf16.msra.mxu1 %v2921_v50 }
 0x724   : > { %v1442_v10 = vpop.f32.mrb[12].mxu0  ;;  %v1513_v15 = vpop.f32.mrb[12].mxu1 }
 0x725   : > { %v1518_v18 = vadd.f32 %v1870_v8, %v1442_v10  ;;  %v1444_v26 = vpop.f32.mrb[13].mxu0  ;;  %v1515_v27 = vpop.f32.mrb[13].mxu1  ;;  %v1520_v46 = vadd.f32 %v1872_v43, %v1513_v15 }
 0x726   : > { %v1519_v31 = vadd.f32 %v1871_v9, %v1444_v26  ;;  %v1521_v49 = vadd.f32 %v1873_v47, %v1515_v27 }
 0x727   : > { %v1874_v34 = vmul.f32 -1.442695, %v1518_v18  ;;  %v1876_v53 = vmul.f32 -1.442695, %v1520_v46 }
 0x728   : > { %v1875_v38 = vmul.f32 -1.442695, %v1519_v31 }
 0x729   : > { %2525 = vpow2.f32 %v1874_v34 }
 0x72a   : > { %2527 = vpow2.f32 %v1875_v38 }
 0x72b   : > { %2529 = vtanh.f32 %v1521_v49 }
 0x72c   : > { %2531 = vpow2.f32 %v1876_v53 }
 0x733   : > { %v2526_v56 = vpop.eup %2525 }
 0x734   : > { %v1525_v59 = vadd.f32 1.0, %v2526_v56  ;;  %v2528_v63 = vpop.eup %2527 }
 0x735   : > { %v1531_v1 = vadd.f32 1.0, %v2528_v63  ;;  %v2530_v7 = vpop.eup %2529 }
 0x736   : > { %2533 = vrcp.f32 %v1525_v59  ;;  %v2532_v11 = vpop.eup %2531 }
 0x737   : > { %2535 = vrcp.f32 %v1531_v1  ;;  %v1537_v28 = vadd.f32 1.0, %v2532_v11 }
 0x739   : > { %2537 = vrcp.f32 %v1537_v28 }
 0x740   : > { %v2534_v16 = vpop.eup %2533 }
 0x741   : > { %v1542_v19 = vmul.f32 %v2534_v16, %v2530_v7  ;;  %v2536_v25 = vpop.eup %2535 }
 0x742   : > { %v1541_v32 = vmul.f32 %v2536_v25, %v3180_v55 }
 0x743   : > { %v2538_v40 = vpop.eup %2537 }
 0x744   : > { %v1543_v33 = vadd.f32 %v1542_v19, %v1541_v32 }
 0x746   : > { %2539 = vtanh.f32 %v1543_v33 }
 0x750   : > { %v2540_v41 = vpop.eup %2539 }
 0x751   : > { %v1545_v50 = vmul.f32 %v2540_v41, %v2538_v40 }
 0x753   : > { %v1548_v39 = vadd.f32 %v1877_v42, %v1545_v50 }
 0x755   : > { %1619 = vmatmul.mubr.f32.vlgmr.msra.gmra.mrb[14].mxu0 %v1548_v39  ;;  %1690 = vmatmul.mubr.f32.vlgmr.msra.gmra.mrb[14].mxu1 %v1548_v39 }
 0x828   : > { %v1620_v62 = vpop.f32.mrb[14].mxu0  ;;  %v1691_v0 = vpop.f32.mrb[14].mxu1 }
 0x829   : > { %v1696_v2 = vadd.f32 %v1878_v54, %v1620_v62  ;;  %v1622_v3 = vpop.f32.mrb[15].mxu0  ;;  %v1693_v5 = vpop.f32.mrb[15].mxu1  ;;  %v1698_v17 = vadd.f32 %v1880_v14, %v1691_v0 }
 0x82a   : > { %v1697_v6 = vadd.f32 %v1879_v61, %v1622_v3  ;;  %v1699_v21 = vadd.f32 %v1881_v20, %v1693_v5 }
 0x82b   : > { %v1882_v12 = vmul.f32 -1.442695, %v1696_v2  ;;  %v1884_v4 = vmul.f32 -1.442695, %v1698_v17 }
 0x82c   : > { %v1883_v13 = vmul.f32 -1.442695, %v1697_v6 }
 0x82d   : > { %2541 = vpow2.f32 %v1882_v12 }
 0x82e   : > { %2543 = vpow2.f32 %v1883_v13 }
 0x82f   : > { %2545 = vtanh.f32 %v1699_v21 }
 0x830   : > { %2547 = vpow2.f32 %v1884_v4 }
 0x837   : > { %v2542_v22 = vpop.eup %2541 }
 0x838   : > { %v1703_v24 = vadd.f32 1.0, %v2542_v22  ;;  %v2544_v23 = vpop.eup %2543 }
 0x839   : > { %v1709_v29 = vadd.f32 1.0, %v2544_v23  ;;  %v2546_v30 = vpop.eup %2545 }
 0x83a   : > { %2549 = vrcp.f32 %v1703_v24  ;;  %v2548_v35 = vpop.eup %2547 }
 0x83b   : > { %2551 = vrcp.f32 %v1709_v29  ;;  %v1715_v48 = vadd.f32 1.0, %v2548_v35 }
 0x83d   : > { %2553 = vrcp.f32 %v1715_v48 }
 0x844   : > { %v2550_v36 = vpop.eup %2549 }
 0x845   : > { %v1720_v37 = vmul.f32 %v2550_v36, %v2546_v30  ;;  %v2552_v44 = vpop.eup %2551 }
 0x846   : > { %v1719_v52 = vmul.f32 %v2552_v44, %v1543_v33 }
 0x847   : > { %v2554_v57 = vpop.eup %2553 }
 0x848   : > { %v1721_v55 = vadd.f32 %v1720_v37, %v1719_v52 }
 0x84a   : > { %2555 = vtanh.f32 %v1721_v55  ;;  %1728 = vst [vmem:[#allocation3] sm:$0xff] %v1721_v55 }
 0x853   : > { %1732 = sbr.rel (%p1886_p6) target bundleno = 2138 (0x85a), region = 40 }
 0x854   : > { %v2556_v45 = vpop.eup %2555 }
 0x855   : > { %v1723_v51 = vmul.f32 %v2556_v45, %v2554_v57 }
 0x857   : > { %v1726_v60 = vadd.f32 %v1885_v58, %v1723_v51 }
 0x859   : > { %1727 = vst [vmem:[#allocation2] sm:$0xff] %v1726_v60  ;;  %1733 = vst [vmem:[%s3243_s3] sm:$0xff] (!%p1886_p6), %v1726_v60 }
 0x85a PF: > { %s13_s14 = sadd.s32 1, %s2579_s14   ;;  %s3244_s12 = smov %s2575_s13 }
 0x85b   : > { %p10_p7 = scmp.ge.s32.totalorder %s13_s14, 4   ;;  %s3245_s13 = smov %s3247_s15 }
 0x85d   :  { %12 = sbr.rel (!%p10_p7) target bundleno = 2 (0x2), region = 87 }

</bundles_post_ra>
